<compile_context>
chip_gen: v5e
topology: v5e:2x2
jax: 0.10.0
libtpu: 0.0.40
codegen_flags: <defaults>
</compile_context>

<pallas_src>
import functools

import jax
import jax.numpy as jnp
import numpy as np
from jax.experimental import pallas as pl
from jax.experimental.pallas import tpu as pltpu


_SQRT_2_OVER_PI = 0.7978845608028654


def _gelu_tanh(x):
    return 0.5 * x * (1.0 + jnp.tanh(_SQRT_2_OVER_PI * (x + 0.044715 * x * x * x)))


def _layer_norm(x, w, b, eps=1e-5):
    mu = jnp.mean(x, axis=-1, keepdims=True)
    xc = x - mu
    var = jnp.mean(xc * xc, axis=-1, keepdims=True)
    return xc * jax.lax.rsqrt(var + eps) * w + b


def _encoder_block_kernel(x_ref, ln1w_ref, ln1b_ref, wqkv_ref, wp_ref, bp_ref,
                          ln2w_ref, ln2b_ref, w1_ref, b1_ref, w2_ref, b2_ref,
                          o_ref, *, num_heads, mm_dtype):
    bt, n, c = x_ref.shape
    hd = c // num_heads
    rows = bt * n

    # (bt, N, C) -> (bt*N, C): leading-dim merge, lanes unchanged (free).
    x = x_ref[...].reshape(rows, c).astype(jnp.float32)

    # ---------------- Attention branch ----------------
    nx = _layer_norm(x, ln1w_ref[...], ln1b_ref[...])

    # Fused QKV projection: bf16 activations x bf16 weights (weights already
    # stored in mm_dtype -> no in-kernel weight cast), f32 accumulation.
    # The attention scale was pre-folded into the q columns of wqkv.
    qkv = jnp.dot(nx.astype(mm_dtype), wqkv_ref[...],
                  preferred_element_type=jnp.float32)            # (rows, 3C)

    # Single cast before the head loop; only the bf16 copy stays live.
    qkv_mm = qkv.astype(mm_dtype)

    # Residual-1 accumulator: start from x + proj bias, then fold the output
    # projection into the head loop as a sum over (hd, C) slices of wproj
    # (avoids the lane-axis concat of per-head 32-wide context slices).
    x = x + bp_ref[...]
    for h in range(num_heads):                                   # static unroll
        lo = h * hd
        qh = qkv_mm[:, lo:lo + hd].reshape(bt, n, hd)
        kh = qkv_mm[:, c + lo:c + lo + hd].reshape(bt, n, hd)
        vh = qkv_mm[:, 2 * c + lo:2 * c + lo + hd].reshape(bt, n, hd)

        s = jnp.einsum('bqd,bkd->bqk', qh, kh,
                       preferred_element_type=jnp.float32)       # (bt, N, N)

        m = jnp.max(s, axis=-1, keepdims=True)
        e = jnp.exp(s - m)
        denom = jnp.sum(e, axis=-1, keepdims=True)
        p = e * pl.reciprocal(denom, approx=True)                # softmax probs

        ctx_h = jnp.einsum('bqk,bkd->bqd', p.astype(mm_dtype), vh,
                           preferred_element_type=jnp.float32)   # (bt, N, hd)

        # Accumulating output projection: ctx_h @ wproj[lo:lo+hd, :].
        x = x + jnp.dot(ctx_h.reshape(rows, hd).astype(mm_dtype),
                        wp_ref[lo:lo + hd, :],
                        preferred_element_type=jnp.float32)

    # ---------------- MLP branch ----------------
    nx2 = _layer_norm(x, ln2w_ref[...], ln2b_ref[...])
    hmid = jnp.dot(nx2.astype(mm_dtype), w1_ref[...],
                   preferred_element_type=jnp.float32) + b1_ref[...]
    hmid = _gelu_tanh(hmid)
    mlp_out = jnp.dot(hmid.astype(mm_dtype), w2_ref[...],
                      preferred_element_type=jnp.float32) + b2_ref[...]

    x = x + mlp_out                                              # residual 2

    # (rows, C) -> (bt, N, C): leading-dim split; C multiple of 128 ->
    # unmasked full-lane stores.
    o_ref[...] = x.reshape(bt, n, c).astype(o_ref.dtype)


def prepare_encoder_block_params(ln1w, ln1b, wqkv, wproj, bproj, ln2w, ln2b,
                                 wfc1, bfc1, wfc2, bfc2, *, num_heads,
                                 matmul_dtype=jnp.bfloat16):
    """One-time parameter prep (do NOT call per forward step).

    Folds the attention scale into the q columns of the fused QKV weight,
    casts the four big weight matrices to bf16 for the kernel, and reshapes
    biases / LN params to lane-dense (1, C) rows kept in f32.
    Weights are stored as (in, out) = W^T of nn.Linear.
    """
    C = wqkv.shape[0]
    hidden = wfc1.shape[1]
    hd = C // num_heads
    scale = hd ** (-0.5)

    wqkv = wqkv.at[:, :C].multiply(scale)

    f32 = jnp.float32
    return (
        ln1w.reshape(1, C).astype(f32), ln1b.reshape(1, C).astype(f32),
        wqkv.astype(matmul_dtype),
        wproj.astype(matmul_dtype), bproj.reshape(1, C).astype(f32),
        ln2w.reshape(1, C).astype(f32), ln2b.reshape(1, C).astype(f32),
        wfc1.astype(matmul_dtype), bfc1.reshape(1, hidden).astype(f32),
        wfc2.astype(matmul_dtype), bfc2.reshape(1, C).astype(f32),
    )


def encoder_block(x, params, *, num_heads, block_b=None,
                  matmul_dtype=jnp.bfloat16):
    """x: (B, N, C) -> (B, N, C). `params` from prepare_encoder_block_params."""
    B, N, C = x.shape
    (ln1w, ln1b, wqkv, wproj, bproj, ln2w, ln2b,
     wfc1, bfc1, wfc2, bfc2) = params
    hidden = wfc1.shape[1]

    if block_b is None:
        # Generation-aware grid: v5e/v6e have a single TensorCore, so a multi-
        # step grid only shrinks the MXU M dimension and re-stages the weights.
        # Split into 2 "parallel" steps (v7x's two TCs) only when each step
        # still gets >= 256 flattened rows (a full MXU M pass per core).
        if B % 2 == 0 and (B // 2) * N >= 256:
            block_b = B // 2
        else:
            block_b = B
    assert B % block_b == 0, "block_b must divide B"
    grid = (B // block_b,)

    def full2d(shape):
        return pl.BlockSpec(shape, lambda b: (0, 0))

    kernel = functools.partial(_encoder_block_kernel,
                               num_heads=num_heads, mm_dtype=matmul_dtype)

    return pl.pallas_call(
        kernel,
        out_shape=jax.ShapeDtypeStruct((B, N, C), x.dtype),
        grid_spec=pltpu.PrefetchScalarGridSpec(
            num_scalar_prefetch=0,
            grid=grid,
            in_specs=[
                pl.BlockSpec((block_b, N, C), lambda b: (b, 0, 0)),  # x
                full2d((1, C)), full2d((1, C)),                      # LN1 gamma/beta
                full2d((C, 3 * C)),                                  # fused Wqkv (bf16, q pre-scaled)
                full2d((C, C)), full2d((1, C)),                      # proj W (bf16), b
                full2d((1, C)), full2d((1, C)),                      # LN2 gamma/beta
                full2d((C, hidden)), full2d((1, hidden)),            # fc1 W (bf16), b
                full2d((hidden, C)), full2d((1, C)),                 # fc2 W (bf16), b
            ],
            out_specs=pl.BlockSpec((block_b, N, C), lambda b: (b, 0, 0)),
        ),
        compiler_params=pltpu.CompilerParams(
            dimension_semantics=("parallel",)),
    )(x, ln1w, ln1b, wqkv, wproj, bproj, ln2w, ln2b, wfc1, bfc1, wfc2, bfc2)


def encoder_block_ref(x, ln1w, ln1b, wqkv, wproj, bproj, ln2w, ln2b,
                      wfc1, bfc1, wfc2, bfc2, *, num_heads):
    """Pure-JAX f32 reference mirroring the PyTorch forward (knn_index_intra=None)."""
    B, N, C = x.shape
    hd = C // num_heads
    scale = hd ** (-0.5)

    nx = _layer_norm(x, ln1w, ln1b)
    qkv = (nx @ wqkv).reshape(B, N, 3, num_heads, hd).transpose(2, 0, 3, 1, 4)
    q, k, v = qkv[0], qkv[1], qkv[2]                              # (B, H, N, hd)
    attn = (q @ jnp.swapaxes(k, -1, -2)) * scale
    attn = jax.nn.softmax(attn, axis=-1)
    ctx = (attn @ v).transpose(0, 2, 1, 3).reshape(B, N, C)
    x = x + (ctx @ wproj + bproj)                                 # residual 1

    nx2 = _layer_norm(x, ln2w, ln2b)
    h = _gelu_tanh(nx2 @ wfc1 + bfc1)
    x = x + (h @ wfc2 + bfc2)                                     # residual 2
    return x


if __name__ == "__main__":
    # Small, TPU-friendly shapes: lane-dense feature dims (C=128, hidden=512),
    # head_dim=32, tiny batch/sequence.
    B, N = 2, 16
    dim, num_heads, mlp_ratio = 128, 4, 4.0
    hidden = int(dim * mlp_ratio)

    key = jax.random.PRNGKey(0)
    keys = jax.random.split(key, 12)

    x = jax.random.normal(keys[0], (B, N, dim), dtype=jnp.float32)

    # Deterministic parameter init. Weights stored as (in, out), i.e. W^T
    # relative to PyTorch nn.Linear. qkv_bias=False -> no QKV bias.
    s_d = 1.0 / np.sqrt(dim)
    s_h = 1.0 / np.sqrt(hidden)
    wqkv = jax.random.uniform(keys[1], (dim, 3 * dim), jnp.float32, -s_d, s_d)
    wproj = jax.random.uniform(keys[2], (dim, dim), jnp.float32, -s_d, s_d)
    bproj = jax.random.uniform(keys[3], (dim,), jnp.float32, -s_d, s_d)
    wfc1 = jax.random.uniform(keys[4], (dim, hidden), jnp.float32, -s_d, s_d)
    bfc1 = jax.random.uniform(keys[5], (hidden,), jnp.float32, -s_d, s_d)
    wfc2 = jax.random.uniform(keys[6], (hidden, dim), jnp.float32, -s_h, s_h)
    bfc2 = jax.random.uniform(keys[7], (dim,), jnp.float32, -s_h, s_h)
    ln1w = 1.0 + 0.1 * jax.random.normal(keys[8], (dim,), jnp.float32)
    ln1b = 0.05 * jax.random.normal(keys[9], (dim,), jnp.float32)
    ln2w = 1.0 + 0.1 * jax.random.normal(keys[10], (dim,), jnp.float32)
    ln2b = 0.05 * jax.random.normal(keys[11], (dim,), jnp.float32)

    # One-time parameter preparation (scale fold + bf16 cast), then the kernel.
    params = prepare_encoder_block_params(
        ln1w, ln1b, wqkv, wproj, bproj, ln2w, ln2b,
        wfc1, bfc1, wfc2, bfc2, num_heads=num_heads)
    params = jax.tree_util.tree_map(jax.block_until_ready, params)

    out = encoder_block(x, params, num_heads=num_heads)
    out = jax.block_until_ready(out)

    ref = encoder_block_ref(x, ln1w, ln1b, wqkv, wproj, bproj, ln2w, ln2b,
                            wfc1, bfc1, wfc2, bfc2, num_heads=num_heads)

    # bf16 weights / matmul operands + approx reciprocal -> loosened tolerance
    # vs. the pure-f32 reference (expected small numeric deltas).
    np.testing.assert_allclose(np.asarray(out), np.asarray(ref),
                               rtol=5e-2, atol=5e-2)
    print("KERNEL_OK")
</pallas_src>

<mosaic_0001>
module attributes {stable_mosaic.version = 11 : i64} {
  func.func @_encoder_block_kernel(%arg0: i32, %arg1: memref<2x16x128xf32, #tpu.memory_space<vmem>>, %arg2: memref<1x128xf32, #tpu.memory_space<vmem>>, %arg3: memref<1x128xf32, #tpu.memory_space<vmem>>, %arg4: memref<128x384xbf16, #tpu.memory_space<vmem>>, %arg5: memref<128x128xbf16, #tpu.memory_space<vmem>>, %arg6: memref<1x128xf32, #tpu.memory_space<vmem>>, %arg7: memref<1x128xf32, #tpu.memory_space<vmem>>, %arg8: memref<1x128xf32, #tpu.memory_space<vmem>>, %arg9: memref<128x512xbf16, #tpu.memory_space<vmem>>, %arg10: memref<1x512xf32, #tpu.memory_space<vmem>>, %arg11: memref<512x128xbf16, #tpu.memory_space<vmem>>, %arg12: memref<1x128xf32, #tpu.memory_space<vmem>>, %arg13: memref<2x16x128xf32, #tpu.memory_space<vmem>>) attributes {dimension_semantics = [#tpu.dimension_semantics<parallel>], iteration_bounds = array<i64: 1>, scalar_prefetch = 0 : i64, scratch_operands = 0 : i64, tpu.core_type = #tpu.core_type<tc>, window_params = [{transform_indices = @transform_0, window_bounds = array<i64: 2, 16, 128>}, {pipeline_mode = #tpu.pipeline_mode<synchronous>, transform_indices = @transform_1, window_bounds = array<i64: 1, 128>}, {pipeline_mode = #tpu.pipeline_mode<synchronous>, transform_indices = @transform_2, window_bounds = array<i64: 1, 128>}, {pipeline_mode = #tpu.pipeline_mode<synchronous>, transform_indices = @transform_3, window_bounds = array<i64: 128, 384>}, {pipeline_mode = #tpu.pipeline_mode<synchronous>, transform_indices = @transform_4, window_bounds = array<i64: 128, 128>}, {pipeline_mode = #tpu.pipeline_mode<synchronous>, transform_indices = @transform_5, window_bounds = array<i64: 1, 128>}, {pipeline_mode = #tpu.pipeline_mode<synchronous>, transform_indices = @transform_6, window_bounds = array<i64: 1, 128>}, {pipeline_mode = #tpu.pipeline_mode<synchronous>, transform_indices = @transform_7, window_bounds = array<i64: 1, 128>}, {pipeline_mode = #tpu.pipeline_mode<synchronous>, transform_indices = @transform_8, window_bounds = array<i64: 128, 512>}, {pipeline_mode = #tpu.pipeline_mode<synchronous>, transform_indices = @transform_9, window_bounds = array<i64: 1, 512>}, {pipeline_mode = #tpu.pipeline_mode<synchronous>, transform_indices = @transform_10, window_bounds = array<i64: 512, 128>}, {pipeline_mode = #tpu.pipeline_mode<synchronous>, transform_indices = @transform_11, window_bounds = array<i64: 1, 128>}, {transform_indices = @transform_12, window_bounds = array<i64: 2, 16, 128>}]} {
    %c0 = arith.constant 0 : index
    %c0_0 = arith.constant 0 : index
    %c0_1 = arith.constant 0 : index
    %0 = vector.load %arg1[%c0, %c0_0, %c0_1] : memref<2x16x128xf32, #tpu.memory_space<vmem>>, vector<2x16x128xf32>
    %1 = vector.shape_cast %0 : vector<2x16x128xf32> to vector<32x128xf32>
    %c0_2 = arith.constant 0 : index
    %c0_3 = arith.constant 0 : index
    %2 = vector.load %arg2[%c0_2, %c0_3] : memref<1x128xf32, #tpu.memory_space<vmem>>, vector<1x128xf32>
    %c0_4 = arith.constant 0 : index
    %c0_5 = arith.constant 0 : index
    %3 = vector.load %arg3[%c0_4, %c0_5] : memref<1x128xf32, #tpu.memory_space<vmem>>, vector<1x128xf32>
    %cst = arith.constant dense<0.000000e+00> : vector<32xf32>
    %4 = vector.multi_reduction <add>, %1, %cst [1] : vector<32x128xf32> to vector<32xf32>
    %5 = vector.shape_cast %4 : vector<32xf32> to vector<32x1xf32>
    %cst_6 = arith.constant 1.280000e+02 : f32
    %6 = vector.broadcast %cst_6 : f32 to vector<32x1xf32>
    %7 = arith.divf %5, %6 : vector<32x1xf32>
    %8 = vector.broadcast %7 : vector<32x1xf32> to vector<32x128xf32>
    %9 = arith.subf %1, %8 : vector<32x128xf32>
    %10 = arith.mulf %9, %9 : vector<32x128xf32>
    %cst_7 = arith.constant dense<0.000000e+00> : vector<32xf32>
    %11 = vector.multi_reduction <add>, %10, %cst_7 [1] : vector<32x128xf32> to vector<32xf32>
    %12 = vector.shape_cast %11 : vector<32xf32> to vector<32x1xf32>
    %cst_8 = arith.constant 1.280000e+02 : f32
    %13 = vector.broadcast %cst_8 : f32 to vector<32x1xf32>
    %14 = arith.divf %12, %13 : vector<32x1xf32>
    %cst_9 = arith.constant 9.99999974E-6 : f32
    %15 = vector.broadcast %cst_9 : f32 to vector<32x1xf32>
    %16 = arith.addf %14, %15 : vector<32x1xf32>
    %17 = math.rsqrt %16 : vector<32x1xf32>
    %18 = vector.broadcast %17 : vector<32x1xf32> to vector<32x128xf32>
    %19 = arith.mulf %9, %18 : vector<32x128xf32>
    %20 = vector.broadcast %2 : vector<1x128xf32> to vector<32x128xf32>
    %21 = arith.mulf %19, %20 : vector<32x128xf32>
    %22 = vector.broadcast %3 : vector<1x128xf32> to vector<32x128xf32>
    %23 = arith.addf %21, %22 : vector<32x128xf32>
    %24 = arith.truncf %23 : vector<32x128xf32> to vector<32x128xbf16>
    %c0_10 = arith.constant 0 : index
    %c0_11 = arith.constant 0 : index
    %25 = vector.load %arg4[%c0_10, %c0_11] : memref<128x384xbf16, #tpu.memory_space<vmem>>, vector<128x384xbf16>
    %cst_12 = arith.constant dense<0.000000e+00> : vector<32x384xf32>
    %26 = tpu.matmul %24, %25, %cst_12 {dimension_numbers = #tpu.dot_dimension_numbers<[1], [0], [0], [1], [0, 0, 1, 1], [], []>} : vector<32x128xbf16>, vector<128x384xbf16>, vector<32x384xf32> -> vector<32x384xf32>
    %27 = arith.truncf %26 : vector<32x384xf32> to vector<32x384xbf16>
    %c0_13 = arith.constant 0 : index
    %c0_14 = arith.constant 0 : index
    %28 = vector.load %arg6[%c0_13, %c0_14] : memref<1x128xf32, #tpu.memory_space<vmem>>, vector<1x128xf32>
    %29 = vector.broadcast %28 : vector<1x128xf32> to vector<32x128xf32>
    %30 = arith.addf %1, %29 : vector<32x128xf32>
    %31 = vector.extract_strided_slice %27 {offsets = [0, 0], sizes = [32, 32], strides = [1, 1]} : vector<32x384xbf16> to vector<32x32xbf16>
    %32 = vector.shape_cast %31 : vector<32x32xbf16> to vector<2x16x32xbf16>
    %33 = vector.extract_strided_slice %27 {offsets = [0, 128], sizes = [32, 32], strides = [1, 1]} : vector<32x384xbf16> to vector<32x32xbf16>
    %34 = vector.shape_cast %33 : vector<32x32xbf16> to vector<2x16x32xbf16>
    %35 = vector.extract_strided_slice %27 {offsets = [0, 256], sizes = [32, 32], strides = [1, 1]} : vector<32x384xbf16> to vector<32x32xbf16>
    %36 = vector.shape_cast %35 : vector<32x32xbf16> to vector<2x16x32xbf16>
    "tpu.trace_start"() <{level = 10 : i32, message = "bqd,bkd->bqk"}> : () -> ()
    %cst_15 = arith.constant dense<0.000000e+00> : vector<2x16x16xf32>
    %37 = tpu.matmul %32, %34, %cst_15 {dimension_numbers = #tpu.dot_dimension_numbers<[2], [2], [1], [1], [0, 0, 0, 1, 1, 1], [0], [0]>} : vector<2x16x32xbf16>, vector<2x16x32xbf16>, vector<2x16x16xf32> -> vector<2x16x16xf32>
    "tpu.trace_stop"() : () -> ()
    %cst_16 = arith.constant dense<0xFF800000> : vector<2x16xf32>
    %38 = vector.multi_reduction <maximumf>, %37, %cst_16 [2] : vector<2x16x16xf32> to vector<2x16xf32>
    %39 = vector.shape_cast %38 : vector<2x16xf32> to vector<2x16x1xf32>
    %40 = vector.broadcast %39 : vector<2x16x1xf32> to vector<2x16x16xf32>
    %41 = arith.subf %37, %40 : vector<2x16x16xf32>
    %42 = math.exp %41 : vector<2x16x16xf32>
    %cst_17 = arith.constant dense<0.000000e+00> : vector<2x16xf32>
    %43 = vector.multi_reduction <add>, %42, %cst_17 [2] : vector<2x16x16xf32> to vector<2x16xf32>
    %44 = vector.shape_cast %43 : vector<2x16xf32> to vector<2x16x1xf32>
    %45 = tpu.reciprocal %44 {approx = true} : vector<2x16x1xf32> -> vector<2x16x1xf32>
    %46 = vector.broadcast %45 : vector<2x16x1xf32> to vector<2x16x16xf32>
    %47 = arith.mulf %42, %46 : vector<2x16x16xf32>
    %48 = arith.truncf %47 : vector<2x16x16xf32> to vector<2x16x16xbf16>
    "tpu.trace_start"() <{level = 10 : i32, message = "bqk,bkd->bqd"}> : () -> ()
    %cst_18 = arith.constant dense<0.000000e+00> : vector<2x16x32xf32>
    %49 = tpu.matmul %48, %36, %cst_18 {dimension_numbers = #tpu.dot_dimension_numbers<[2], [1], [1], [2], [0, 0, 0, 1, 1, 2], [0], [0]>} : vector<2x16x16xbf16>, vector<2x16x32xbf16>, vector<2x16x32xf32> -> vector<2x16x32xf32>
    "tpu.trace_stop"() : () -> ()
    %50 = vector.shape_cast %49 : vector<2x16x32xf32> to vector<32x32xf32>
    %51 = arith.truncf %50 : vector<32x32xf32> to vector<32x32xbf16>
    %c0_19 = arith.constant 0 : index
    %c0_20 = arith.constant 0 : index
    %52 = vector.load %arg5[%c0_19, %c0_20] : memref<128x128xbf16, #tpu.memory_space<vmem>>, vector<32x128xbf16>
    %cst_21 = arith.constant dense<0.000000e+00> : vector<32x128xf32>
    %53 = tpu.matmul %51, %52, %cst_21 {dimension_numbers = #tpu.dot_dimension_numbers<[1], [0], [0], [1], [0, 0, 1, 1], [], []>} : vector<32x32xbf16>, vector<32x128xbf16>, vector<32x128xf32> -> vector<32x128xf32>
    %54 = arith.addf %30, %53 : vector<32x128xf32>
    %55 = vector.extract_strided_slice %27 {offsets = [0, 32], sizes = [32, 32], strides = [1, 1]} : vector<32x384xbf16> to vector<32x32xbf16>
    %56 = vector.shape_cast %55 : vector<32x32xbf16> to vector<2x16x32xbf16>
    %57 = vector.extract_strided_slice %27 {offsets = [0, 160], sizes = [32, 32], strides = [1, 1]} : vector<32x384xbf16> to vector<32x32xbf16>
    %58 = vector.shape_cast %57 : vector<32x32xbf16> to vector<2x16x32xbf16>
    %59 = vector.extract_strided_slice %27 {offsets = [0, 288], sizes = [32, 32], strides = [1, 1]} : vector<32x384xbf16> to vector<32x32xbf16>
    %60 = vector.shape_cast %59 : vector<32x32xbf16> to vector<2x16x32xbf16>
    "tpu.trace_start"() <{level = 10 : i32, message = "bqd,bkd->bqk"}> : () -> ()
    %cst_22 = arith.constant dense<0.000000e+00> : vector<2x16x16xf32>
    %61 = tpu.matmul %56, %58, %cst_22 {dimension_numbers = #tpu.dot_dimension_numbers<[2], [2], [1], [1], [0, 0, 0, 1, 1, 1], [0], [0]>} : vector<2x16x32xbf16>, vector<2x16x32xbf16>, vector<2x16x16xf32> -> vector<2x16x16xf32>
    "tpu.trace_stop"() : () -> ()
    %cst_23 = arith.constant dense<0xFF800000> : vector<2x16xf32>
    %62 = vector.multi_reduction <maximumf>, %61, %cst_23 [2] : vector<2x16x16xf32> to vector<2x16xf32>
    %63 = vector.shape_cast %62 : vector<2x16xf32> to vector<2x16x1xf32>
    %64 = vector.broadcast %63 : vector<2x16x1xf32> to vector<2x16x16xf32>
    %65 = arith.subf %61, %64 : vector<2x16x16xf32>
    %66 = math.exp %65 : vector<2x16x16xf32>
    %cst_24 = arith.constant dense<0.000000e+00> : vector<2x16xf32>
    %67 = vector.multi_reduction <add>, %66, %cst_24 [2] : vector<2x16x16xf32> to vector<2x16xf32>
    %68 = vector.shape_cast %67 : vector<2x16xf32> to vector<2x16x1xf32>
    %69 = tpu.reciprocal %68 {approx = true} : vector<2x16x1xf32> -> vector<2x16x1xf32>
    %70 = vector.broadcast %69 : vector<2x16x1xf32> to vector<2x16x16xf32>
    %71 = arith.mulf %66, %70 : vector<2x16x16xf32>
    %72 = arith.truncf %71 : vector<2x16x16xf32> to vector<2x16x16xbf16>
    "tpu.trace_start"() <{level = 10 : i32, message = "bqk,bkd->bqd"}> : () -> ()
    %cst_25 = arith.constant dense<0.000000e+00> : vector<2x16x32xf32>
    %73 = tpu.matmul %72, %60, %cst_25 {dimension_numbers = #tpu.dot_dimension_numbers<[2], [1], [1], [2], [0, 0, 0, 1, 1, 2], [0], [0]>} : vector<2x16x16xbf16>, vector<2x16x32xbf16>, vector<2x16x32xf32> -> vector<2x16x32xf32>
    "tpu.trace_stop"() : () -> ()
    %74 = vector.shape_cast %73 : vector<2x16x32xf32> to vector<32x32xf32>
    %75 = arith.truncf %74 : vector<32x32xf32> to vector<32x32xbf16>
    %c32 = arith.constant 32 : index
    %c0_26 = arith.constant 0 : index
    %76 = vector.load %arg5[%c32, %c0_26] : memref<128x128xbf16, #tpu.memory_space<vmem>>, vector<32x128xbf16>
    %cst_27 = arith.constant dense<0.000000e+00> : vector<32x128xf32>
    %77 = tpu.matmul %75, %76, %cst_27 {dimension_numbers = #tpu.dot_dimension_numbers<[1], [0], [0], [1], [0, 0, 1, 1], [], []>} : vector<32x32xbf16>, vector<32x128xbf16>, vector<32x128xf32> -> vector<32x128xf32>
    %78 = arith.addf %54, %77 : vector<32x128xf32>
    %79 = vector.extract_strided_slice %27 {offsets = [0, 64], sizes = [32, 32], strides = [1, 1]} : vector<32x384xbf16> to vector<32x32xbf16>
    %80 = vector.shape_cast %79 : vector<32x32xbf16> to vector<2x16x32xbf16>
    %81 = vector.extract_strided_slice %27 {offsets = [0, 192], sizes = [32, 32], strides = [1, 1]} : vector<32x384xbf16> to vector<32x32xbf16>
    %82 = vector.shape_cast %81 : vector<32x32xbf16> to vector<2x16x32xbf16>
    %83 = vector.extract_strided_slice %27 {offsets = [0, 320], sizes = [32, 32], strides = [1, 1]} : vector<32x384xbf16> to vector<32x32xbf16>
    %84 = vector.shape_cast %83 : vector<32x32xbf16> to vector<2x16x32xbf16>
    "tpu.trace_start"() <{level = 10 : i32, message = "bqd,bkd->bqk"}> : () -> ()
    %cst_28 = arith.constant dense<0.000000e+00> : vector<2x16x16xf32>
    %85 = tpu.matmul %80, %82, %cst_28 {dimension_numbers = #tpu.dot_dimension_numbers<[2], [2], [1], [1], [0, 0, 0, 1, 1, 1], [0], [0]>} : vector<2x16x32xbf16>, vector<2x16x32xbf16>, vector<2x16x16xf32> -> vector<2x16x16xf32>
    "tpu.trace_stop"() : () -> ()
    %cst_29 = arith.constant dense<0xFF800000> : vector<2x16xf32>
    %86 = vector.multi_reduction <maximumf>, %85, %cst_29 [2] : vector<2x16x16xf32> to vector<2x16xf32>
    %87 = vector.shape_cast %86 : vector<2x16xf32> to vector<2x16x1xf32>
    %88 = vector.broadcast %87 : vector<2x16x1xf32> to vector<2x16x16xf32>
    %89 = arith.subf %85, %88 : vector<2x16x16xf32>
    %90 = math.exp %89 : vector<2x16x16xf32>
    %cst_30 = arith.constant dense<0.000000e+00> : vector<2x16xf32>
    %91 = vector.multi_reduction <add>, %90, %cst_30 [2] : vector<2x16x16xf32> to vector<2x16xf32>
    %92 = vector.shape_cast %91 : vector<2x16xf32> to vector<2x16x1xf32>
    %93 = tpu.reciprocal %92 {approx = true} : vector<2x16x1xf32> -> vector<2x16x1xf32>
    %94 = vector.broadcast %93 : vector<2x16x1xf32> to vector<2x16x16xf32>
    %95 = arith.mulf %90, %94 : vector<2x16x16xf32>
    %96 = arith.truncf %95 : vector<2x16x16xf32> to vector<2x16x16xbf16>
    "tpu.trace_start"() <{level = 10 : i32, message = "bqk,bkd->bqd"}> : () -> ()
    %cst_31 = arith.constant dense<0.000000e+00> : vector<2x16x32xf32>
    %97 = tpu.matmul %96, %84, %cst_31 {dimension_numbers = #tpu.dot_dimension_numbers<[2], [1], [1], [2], [0, 0, 0, 1, 1, 2], [0], [0]>} : vector<2x16x16xbf16>, vector<2x16x32xbf16>, vector<2x16x32xf32> -> vector<2x16x32xf32>
    "tpu.trace_stop"() : () -> ()
    %98 = vector.shape_cast %97 : vector<2x16x32xf32> to vector<32x32xf32>
    %99 = arith.truncf %98 : vector<32x32xf32> to vector<32x32xbf16>
    %c64 = arith.constant 64 : index
    %c0_32 = arith.constant 0 : index
    %100 = vector.load %arg5[%c64, %c0_32] : memref<128x128xbf16, #tpu.memory_space<vmem>>, vector<32x128xbf16>
    %cst_33 = arith.constant dense<0.000000e+00> : vector<32x128xf32>
    %101 = tpu.matmul %99, %100, %cst_33 {dimension_numbers = #tpu.dot_dimension_numbers<[1], [0], [0], [1], [0, 0, 1, 1], [], []>} : vector<32x32xbf16>, vector<32x128xbf16>, vector<32x128xf32> -> vector<32x128xf32>
    %102 = arith.addf %78, %101 : vector<32x128xf32>
    %103 = vector.extract_strided_slice %27 {offsets = [0, 96], sizes = [32, 32], strides = [1, 1]} : vector<32x384xbf16> to vector<32x32xbf16>
    %104 = vector.shape_cast %103 : vector<32x32xbf16> to vector<2x16x32xbf16>
    %105 = vector.extract_strided_slice %27 {offsets = [0, 224], sizes = [32, 32], strides = [1, 1]} : vector<32x384xbf16> to vector<32x32xbf16>
    %106 = vector.shape_cast %105 : vector<32x32xbf16> to vector<2x16x32xbf16>
    %107 = vector.extract_strided_slice %27 {offsets = [0, 352], sizes = [32, 32], strides = [1, 1]} : vector<32x384xbf16> to vector<32x32xbf16>
    %108 = vector.shape_cast %107 : vector<32x32xbf16> to vector<2x16x32xbf16>
    "tpu.trace_start"() <{level = 10 : i32, message = "bqd,bkd->bqk"}> : () -> ()
    %cst_34 = arith.constant dense<0.000000e+00> : vector<2x16x16xf32>
    %109 = tpu.matmul %104, %106, %cst_34 {dimension_numbers = #tpu.dot_dimension_numbers<[2], [2], [1], [1], [0, 0, 0, 1, 1, 1], [0], [0]>} : vector<2x16x32xbf16>, vector<2x16x32xbf16>, vector<2x16x16xf32> -> vector<2x16x16xf32>
    "tpu.trace_stop"() : () -> ()
    %cst_35 = arith.constant dense<0xFF800000> : vector<2x16xf32>
    %110 = vector.multi_reduction <maximumf>, %109, %cst_35 [2] : vector<2x16x16xf32> to vector<2x16xf32>
    %111 = vector.shape_cast %110 : vector<2x16xf32> to vector<2x16x1xf32>
    %112 = vector.broadcast %111 : vector<2x16x1xf32> to vector<2x16x16xf32>
    %113 = arith.subf %109, %112 : vector<2x16x16xf32>
    %114 = math.exp %113 : vector<2x16x16xf32>
    %cst_36 = arith.constant dense<0.000000e+00> : vector<2x16xf32>
    %115 = vector.multi_reduction <add>, %114, %cst_36 [2] : vector<2x16x16xf32> to vector<2x16xf32>
    %116 = vector.shape_cast %115 : vector<2x16xf32> to vector<2x16x1xf32>
    %117 = tpu.reciprocal %116 {approx = true} : vector<2x16x1xf32> -> vector<2x16x1xf32>
    %118 = vector.broadcast %117 : vector<2x16x1xf32> to vector<2x16x16xf32>
    %119 = arith.mulf %114, %118 : vector<2x16x16xf32>
    %120 = arith.truncf %119 : vector<2x16x16xf32> to vector<2x16x16xbf16>
    "tpu.trace_start"() <{level = 10 : i32, message = "bqk,bkd->bqd"}> : () -> ()
    %cst_37 = arith.constant dense<0.000000e+00> : vector<2x16x32xf32>
    %121 = tpu.matmul %120, %108, %cst_37 {dimension_numbers = #tpu.dot_dimension_numbers<[2], [1], [1], [2], [0, 0, 0, 1, 1, 2], [0], [0]>} : vector<2x16x16xbf16>, vector<2x16x32xbf16>, vector<2x16x32xf32> -> vector<2x16x32xf32>
    "tpu.trace_stop"() : () -> ()
    %122 = vector.shape_cast %121 : vector<2x16x32xf32> to vector<32x32xf32>
    %123 = arith.truncf %122 : vector<32x32xf32> to vector<32x32xbf16>
    %c96 = arith.constant 96 : index
    %c0_38 = arith.constant 0 : index
    %124 = vector.load %arg5[%c96, %c0_38] : memref<128x128xbf16, #tpu.memory_space<vmem>>, vector<32x128xbf16>
    %cst_39 = arith.constant dense<0.000000e+00> : vector<32x128xf32>
    %125 = tpu.matmul %123, %124, %cst_39 {dimension_numbers = #tpu.dot_dimension_numbers<[1], [0], [0], [1], [0, 0, 1, 1], [], []>} : vector<32x32xbf16>, vector<32x128xbf16>, vector<32x128xf32> -> vector<32x128xf32>
    %126 = arith.addf %102, %125 : vector<32x128xf32>
    %c0_40 = arith.constant 0 : index
    %c0_41 = arith.constant 0 : index
    %127 = vector.load %arg7[%c0_40, %c0_41] : memref<1x128xf32, #tpu.memory_space<vmem>>, vector<1x128xf32>
    %c0_42 = arith.constant 0 : index
    %c0_43 = arith.constant 0 : index
    %128 = vector.load %arg8[%c0_42, %c0_43] : memref<1x128xf32, #tpu.memory_space<vmem>>, vector<1x128xf32>
    %cst_44 = arith.constant dense<0.000000e+00> : vector<32xf32>
    %129 = vector.multi_reduction <add>, %126, %cst_44 [1] : vector<32x128xf32> to vector<32xf32>
    %130 = vector.shape_cast %129 : vector<32xf32> to vector<32x1xf32>
    %cst_45 = arith.constant 1.280000e+02 : f32
    %131 = vector.broadcast %cst_45 : f32 to vector<32x1xf32>
    %132 = arith.divf %130, %131 : vector<32x1xf32>
    %133 = vector.broadcast %132 : vector<32x1xf32> to vector<32x128xf32>
    %134 = arith.subf %126, %133 : vector<32x128xf32>
    %135 = arith.mulf %134, %134 : vector<32x128xf32>
    %cst_46 = arith.constant dense<0.000000e+00> : vector<32xf32>
    %136 = vector.multi_reduction <add>, %135, %cst_46 [1] : vector<32x128xf32> to vector<32xf32>
    %137 = vector.shape_cast %136 : vector<32xf32> to vector<32x1xf32>
    %cst_47 = arith.constant 1.280000e+02 : f32
    %138 = vector.broadcast %cst_47 : f32 to vector<32x1xf32>
    %139 = arith.divf %137, %138 : vector<32x1xf32>
    %cst_48 = arith.constant 9.99999974E-6 : f32
    %140 = vector.broadcast %cst_48 : f32 to vector<32x1xf32>
    %141 = arith.addf %139, %140 : vector<32x1xf32>
    %142 = math.rsqrt %141 : vector<32x1xf32>
    %143 = vector.broadcast %142 : vector<32x1xf32> to vector<32x128xf32>
    %144 = arith.mulf %134, %143 : vector<32x128xf32>
    %145 = vector.broadcast %127 : vector<1x128xf32> to vector<32x128xf32>
    %146 = arith.mulf %144, %145 : vector<32x128xf32>
    %147 = vector.broadcast %128 : vector<1x128xf32> to vector<32x128xf32>
    %148 = arith.addf %146, %147 : vector<32x128xf32>
    %149 = arith.truncf %148 : vector<32x128xf32> to vector<32x128xbf16>
    %c0_49 = arith.constant 0 : index
    %c0_50 = arith.constant 0 : index
    %150 = vector.load %arg9[%c0_49, %c0_50] : memref<128x512xbf16, #tpu.memory_space<vmem>>, vector<128x512xbf16>
    %cst_51 = arith.constant dense<0.000000e+00> : vector<32x512xf32>
    %151 = tpu.matmul %149, %150, %cst_51 {dimension_numbers = #tpu.dot_dimension_numbers<[1], [0], [0], [1], [0, 0, 1, 1], [], []>} : vector<32x128xbf16>, vector<128x512xbf16>, vector<32x512xf32> -> vector<32x512xf32>
    %c0_52 = arith.constant 0 : index
    %c0_53 = arith.constant 0 : index
    %152 = vector.load %arg10[%c0_52, %c0_53] : memref<1x512xf32, #tpu.memory_space<vmem>>, vector<1x512xf32>
    %153 = vector.broadcast %152 : vector<1x512xf32> to vector<32x512xf32>
    %154 = arith.addf %151, %153 : vector<32x512xf32>
    %cst_54 = arith.constant 5.000000e-01 : f32
    %155 = vector.broadcast %cst_54 : f32 to vector<32x512xf32>
    %156 = arith.mulf %155, %154 : vector<32x512xf32>
    %cst_55 = arith.constant 4.471500e-02 : f32
    %157 = vector.broadcast %cst_55 : f32 to vector<32x512xf32>
    %158 = arith.mulf %157, %154 : vector<32x512xf32>
    %159 = arith.mulf %158, %154 : vector<32x512xf32>
    %160 = arith.mulf %159, %154 : vector<32x512xf32>
    %161 = arith.addf %154, %160 : vector<32x512xf32>
    %cst_56 = arith.constant 0.797884583 : f32
    %162 = vector.broadcast %cst_56 : f32 to vector<32x512xf32>
    %163 = arith.mulf %162, %161 : vector<32x512xf32>
    %164 = math.tanh %163 : vector<32x512xf32>
    %cst_57 = arith.constant 1.000000e+00 : f32
    %165 = vector.broadcast %cst_57 : f32 to vector<32x512xf32>
    %166 = arith.addf %165, %164 : vector<32x512xf32>
    %167 = arith.mulf %156, %166 : vector<32x512xf32>
    %168 = arith.truncf %167 : vector<32x512xf32> to vector<32x512xbf16>
    %c0_58 = arith.constant 0 : index
    %c0_59 = arith.constant 0 : index
    %169 = vector.load %arg11[%c0_58, %c0_59] : memref<512x128xbf16, #tpu.memory_space<vmem>>, vector<512x128xbf16>
    %cst_60 = arith.constant dense<0.000000e+00> : vector<32x128xf32>
    %170 = tpu.matmul %168, %169, %cst_60 {dimension_numbers = #tpu.dot_dimension_numbers<[1], [0], [0], [1], [0, 0, 1, 1], [], []>} : vector<32x512xbf16>, vector<512x128xbf16>, vector<32x128xf32> -> vector<32x128xf32>
    %c0_61 = arith.constant 0 : index
    %c0_62 = arith.constant 0 : index
    %171 = vector.load %arg12[%c0_61, %c0_62] : memref<1x128xf32, #tpu.memory_space<vmem>>, vector<1x128xf32>
    %172 = vector.broadcast %171 : vector<1x128xf32> to vector<32x128xf32>
    %173 = arith.addf %170, %172 : vector<32x128xf32>
    %174 = arith.addf %126, %173 : vector<32x128xf32>
    %175 = vector.shape_cast %174 : vector<32x128xf32> to vector<2x16x128xf32>
    %c0_63 = arith.constant 0 : index
    %c0_64 = arith.constant 0 : index
    %c0_65 = arith.constant 0 : index
    %176 = vector.load %arg13[%c0_63, %c0_64, %c0_65] : memref<2x16x128xf32, #tpu.memory_space<vmem>>, vector<2x16x128xf32>
    tpu.vector_store %arg13[%c0_63, %c0_64, %c0_65], %175 {strides = array<i32>} : memref<2x16x128xf32, #tpu.memory_space<vmem>>, vector<2x16x128xf32>,
    return
  }
  func.func @transform_0(%arg0: i32) -> (i32, i32, i32) {
    %c0_i32 = arith.constant 0 : i32
    %c0_i32_0 = arith.constant 0 : i32
    %c0_i32_1 = arith.constant 0 : i32
    return %arg0, %c0_i32, %c0_i32_0 : i32, i32, i32
  }
  func.func @transform_1(%arg0: i32) -> (i32, i32) {
    %c0_i32 = arith.constant 0 : i32
    %c0_i32_0 = arith.constant 0 : i32
    %c0_i32_1 = arith.constant 0 : i32
    return %c0_i32, %c0_i32_0 : i32, i32
  }
  func.func @transform_2(%arg0: i32) -> (i32, i32) {
    %c0_i32 = arith.constant 0 : i32
    %c0_i32_0 = arith.constant 0 : i32
    %c0_i32_1 = arith.constant 0 : i32
    return %c0_i32, %c0_i32_0 : i32, i32
  }
  func.func @transform_3(%arg0: i32) -> (i32, i32) {
    %c0_i32 = arith.constant 0 : i32
    %c0_i32_0 = arith.constant 0 : i32
    %c0_i32_1 = arith.constant 0 : i32
    return %c0_i32, %c0_i32_0 : i32, i32
  }
  func.func @transform_4(%arg0: i32) -> (i32, i32) {
    %c0_i32 = arith.constant 0 : i32
    %c0_i32_0 = arith.constant 0 : i32
    %c0_i32_1 = arith.constant 0 : i32
    return %c0_i32, %c0_i32_0 : i32, i32
  }
  func.func @transform_5(%arg0: i32) -> (i32, i32) {
    %c0_i32 = arith.constant 0 : i32
    %c0_i32_0 = arith.constant 0 : i32
    %c0_i32_1 = arith.constant 0 : i32
    return %c0_i32, %c0_i32_0 : i32, i32
  }
  func.func @transform_6(%arg0: i32) -> (i32, i32) {
    %c0_i32 = arith.constant 0 : i32
    %c0_i32_0 = arith.constant 0 : i32
    %c0_i32_1 = arith.constant 0 : i32
    return %c0_i32, %c0_i32_0 : i32, i32
  }
  func.func @transform_7(%arg0: i32) -> (i32, i32) {
    %c0_i32 = arith.constant 0 : i32
    %c0_i32_0 = arith.constant 0 : i32
    %c0_i32_1 = arith.constant 0 : i32
    return %c0_i32, %c0_i32_0 : i32, i32
  }
  func.func @transform_8(%arg0: i32) -> (i32, i32) {
    %c0_i32 = arith.constant 0 : i32
    %c0_i32_0 = arith.constant 0 : i32
    %c0_i32_1 = arith.constant 0 : i32
    return %c0_i32, %c0_i32_0 : i32, i32
  }
  func.func @transform_9(%arg0: i32) -> (i32, i32) {
    %c0_i32 = arith.constant 0 : i32
    %c0_i32_0 = arith.constant 0 : i32
    %c0_i32_1 = arith.constant 0 : i32
    return %c0_i32, %c0_i32_0 : i32, i32
  }
  func.func @transform_10(%arg0: i32) -> (i32, i32) {
    %c0_i32 = arith.constant 0 : i32
    %c0_i32_0 = arith.constant 0 : i32
    %c0_i32_1 = arith.constant 0 : i32
    return %c0_i32, %c0_i32_0 : i32, i32
  }
  func.func @transform_11(%arg0: i32) -> (i32, i32) {
    %c0_i32 = arith.constant 0 : i32
    %c0_i32_0 = arith.constant 0 : i32
    %c0_i32_1 = arith.constant 0 : i32
    return %c0_i32, %c0_i32_0 : i32, i32
  }
  func.func @transform_12(%arg0: i32) -> (i32, i32, i32) {
    %c0_i32 = arith.constant 0 : i32
    %c0_i32_0 = arith.constant 0 : i32
    %c0_i32_1 = arith.constant 0 : i32
    return %arg0, %c0_i32, %c0_i32_0 : i32, i32, i32
  }
}

</mosaic_0001>

<bundles_post_ra>
// kernel: tpu_custom_call.1
= control target key start
LH: loop header
LB: loop body
LE: loop exit
PB: predicated region body
PF: predicated region fallthrough
CT: control target
= control target key end

     0   :  { %17 = vsyncpa [#allocation3], 0  ;;  %s3542_s0 = inlined_call_operand.hbm [shape: f32[2,16,128], index: 0, kind: input, shape index: {}]   ;;  %s3543_s1 = inlined_call_operand.hbm [shape: f32[1,128], index: 1, kind: input, shape index: {}]   ;;  %s3544_s2 = inlined_call_operand.vmem [shape: f32[1,128], index: 2, kind: input, shape index: {}]   ;;  %s3545_s3 = inlined_call_operand.hbm [shape: bf16[128,384], index: 3, kind: input, shape index: {}]   ;;  %s3546_s4 = inlined_call_operand.hbm [shape: bf16[128,128], index: 4, kind: input, shape index: {}]   ;;  %s3547_s5 = inlined_call_operand.vmem [shape: f32[1,128], index: 5, kind: input, shape index: {}]   ;;  %s3548_s6 = inlined_call_operand.vmem [shape: f32[1,128], index: 6, kind: input, shape index: {}]   ;;  %s3549_s7 = inlined_call_operand.hbm [shape: f32[1,128], index: 7, kind: input, shape index: {}]   ;;  %s3550_s8 = inlined_call_operand.hbm [shape: bf16[128,512], index: 8, kind: input, shape index: {}]   ;;  %s3551_s9 = inlined_call_operand.vmem [shape: f32[1,512], index: 9, kind: input, shape index: {}]   ;;  %s3552_s10 = inlined_call_operand.hbm [shape: bf16[512,128], index: 10, kind: input, shape index: {}]   ;;  %s3553_s11 = inlined_call_operand.vmem [shape: f32[1,128], index: 11, kind: input, shape index: {}]   ;;  %s3554_s12 = inlined_call_operand.hbm [shape: f32[2,16,128], index: 12, kind: output, shape index: {}]  }
   0x1   :  { %18 = vsyncpa [#allocation6], 0 }
   0x2   :  { %19 = vsyncpa [#allocation9], 0 }
   0x3   :  { %20 = vsyncpa [#allocation12], 0  ;;  %s40_s23 = sshll.u32 %s3543_s1, 4  ;;  %s41_s23 = int_to_ptr.hbm [resolvable:$true] %s40_s23 }
   0x4   :  { %21 = vsyncpa [#allocation4], 0  ;;  %s3066_s24 = smov [#allocation5]   ;;  %s65_s28 = sshll.u32 %s3546_s4, 4  ;;  %s66_s28 = int_to_ptr.hbm [resolvable:$true] %s65_s28 }
   0x5   :  { %s42_s25 = sshll.u32 %s3066_s24, 4  ;;  %s3067_s29 = smov [#allocation8]   ;;  %s43_s25 = int_to_ptr.vmem [resolvable:$true] %s42_s25 }
   0x6   :  { %45 = dma.hbm_to_vmem [thread:$0]  %s41_s23, 16, %s43_s25, [#allocation6]  }
   0x7   :  { %s67_s30 = sshll.u32 %s3067_s29, 4  ;;  %s3068_s13 = smov 64   ;;  %s68_s30 = int_to_ptr.vmem [resolvable:$true] %s67_s30 }
   0x8   :  { %s3069_s14 = smov 4   ;;  %s93_s16 = sshll.u32 %s3550_s8, 4  ;;  %s94_s16 = int_to_ptr.hbm [resolvable:$true] %s93_s16 }
   0x9   :  { %73 = dma.hbm_to_vmem [thread:$0]  %s66_s28, 1024, %s68_s30, [#allocation9], %s3068_s13, %s3068_s13, %s3069_s14  }
   0xa   :  { %s3070_s17 = smov [#allocation11]   ;;  %s26_s20 = sshll.u32 %s3542_s0, 4  ;;  %s27_s20 = int_to_ptr.hbm [resolvable:$true] %s26_s20 }
   0xb   :  { %s95_s18 = sshll.u32 %s3070_s17, 4  ;;  %s3071_s21 = smov 256   ;;  %s96_s18 = int_to_ptr.vmem [resolvable:$true] %s95_s18 }
   0xc   :  { %s3072_s22 = smov 16   ;;  %s3073_s23 = smov [#allocation2]  }
   0xd   :  { %101 = dma.hbm_to_vmem [thread:$0]  %s94_s16, 4096, %s96_s18, [#allocation12], %s3071_s21, %s3071_s21, %s3072_s22  }
   0xe   :  { %s28_s24 = sshll.u32 %s3073_s23, 4  ;;  %s3074_s25 = smov 128   ;;  %s29_s24 = int_to_ptr.vmem [resolvable:$true] %s28_s24 }
   0xf   :  { %s3075_s26 = smov 8   ;;  %s52_s28 = sshll.u32 %s3545_s3, 4  ;;  %s53_s28 = int_to_ptr.hbm [resolvable:$true] %s52_s28 }
  0x10   :  { %34 = dma.hbm_to_vmem [thread:$0]  %s27_s20, 512, %s29_s24, [#allocation3], %s3074_s25, %s3074_s25, %s3075_s26  }
  0x11   :  { %s3076_s29 = smov [#allocation7]   ;;  %s83_s15 = sshll.u32 %s3549_s7, 4  ;;  %s84_s15 = int_to_ptr.hbm [resolvable:$true] %s83_s15 }
  0x12   :  { %s54_s0 = sshll.u32 %s3076_s29, 4  ;;  %s3077_s16 = smov 192   ;;  %s55_s0 = int_to_ptr.vmem [resolvable:$true] %s54_s0 }
  0x13   :  { %s3078_s17 = smov 12   ;;  %s3079_s18 = smov [#allocation10]  }
  0x14   :  { %60 = dma.hbm_to_vmem [thread:$0]  %s53_s28, 3072, %s55_s0, [#allocation6], %s3077_s16, %s3077_s16, %s3078_s17  }
  0x15   :  { %s85_s4 = sshll.u32 %s3079_s18, 4  ;;  %s108_s21 = sshll.u32 %s3552_s10, 4  ;;  %s86_s4 = int_to_ptr.vmem [resolvable:$true] %s85_s4  ;;  %s109_s21 = int_to_ptr.hbm [resolvable:$true] %s108_s21 }
  0x16   :  { %88 = dma.hbm_to_vmem [thread:$0]  %s84_s15, 16, %s86_s4, [#allocation9]  }
  0x17   :  { %s3080_s3 = smov [#allocation13]  }
  0x18   :  { %s110_s22 = sshll.u32 %s3080_s3, 4  ;;  %s111_s22 = int_to_ptr.vmem [resolvable:$true] %s110_s22 }
  0x19   :  { %116 = dma.hbm_to_vmem [thread:$0]  %s109_s21, 4096, %s111_s22, [#allocation12], %s3068_s13, %s3068_s13, %s3069_s14  }
  0x1a   :  { %3056 = dma.done.wait [#allocation3], 512  }
  0x1b   :  { %3057 = vsyncadd [#allocation3], 4294966784 }
  0x1c   :  { %3058 = dma.done.wait [#allocation6], 3088  }
  0x1d   :  { %3059 = vsyncadd [#allocation6], 4294964208 }
  0x1e   :  { %3060 = dma.done.wait [#allocation9], 1040  }
  0x1f   :  { %3061 = vsyncadd [#allocation9], 4294966256 }
  0x20   :  { %3062 = dma.done.wait [#allocation12], 8192  }
  0x21   :  { %3063 = vsyncadd [#allocation12], 4294959104  ;;  %v150_v0 = vld [vmem:[#allocation2 + $0x10] sm:$0xff]  ;;  %v3180_v1 = vld [vmem:[#allocation2] sm:$0xff]  ;;  %v3081_v4 = vmov 128.0   ;;  %vm504_vm13 = vcmask 261120  }
  0x22   :  { %158 = vadd.xlane.f32.xlu1 %v150_v0  ;;  %154 = vadd.xlane.f32.xlu0 %v3180_v1  ;;  %v151_v2 = vld [vmem:[#allocation2 + $0x18] sm:$0xff]  ;;  %v149_v3 = vld [vmem:[#allocation2 + $0x8] sm:$0xff]  ;;  %2747 = vrcp.f32 %v3081_v4  ;;  %v2312_v32 = vld [vmem:[#allocation7 + $0xb0] sm:$0xf]  ;;  %vm551_vm14 = vcmask 130048   ;;  %s3083_s14 = smov 32  }
  0x23   :  { %v2304_v27 = vld [vmem:[#allocation7 + $0xa8] sm:$0xf]  ;;  %v2648_v28 = vld [vmem:[#allocation7 + $0xb0] sm:$0xf0]  ;;  %v2647_v29 = vld [vmem:[#allocation7 + $0xac] sm:$0xf] }
  0x24   :  { %v2305_v30 = vor.u32 %v2648_v28, %v2304_v27  ;;  %v2306_v31 = vld [vmem:[#allocation7 + $0xb4] sm:$0xf0]  ;;  %v2649_v33 = vld [vmem:[#allocation7 + $0xb8] sm:$0xf0]  ;;  %v2292_v36 = vld [vmem:[#allocation7 + $0x90] sm:$0xf] }
  0x25   :  { %v2309_v34 = vor.u32 %v2647_v29, %v2306_v31  ;;  %v2313_v35 = vor.u32 %v2649_v33, %v2312_v32  ;;  %v2645_v37 = vld [vmem:[#allocation7 + $0x98] sm:$0xf0]  ;;  %v2644_v38 = vld [vmem:[#allocation7 + $0x94] sm:$0xf]  ;;  %v2294_v40 = vld [vmem:[#allocation7 + $0x9c] sm:$0xf0] }
  0x26   :  { %417 = vmatpush.bf16.msra.mxu0 %v2305_v30  ;;  %v2293_v39 = vor.u32 %v2645_v37, %v2292_v36  ;;  %v2300_v41 = vld [vmem:[#allocation7 + $0x98] sm:$0xf]  ;;  %v2646_v42 = vld [vmem:[#allocation7 + $0xa0] sm:$0xf0]  ;;  %v2297_v43 = vor.u32 %v2644_v38, %v2294_v40  ;;  %v2641_v47 = vld [vmem:[#allocation7 + $0x7c] sm:$0xf] }
  0x27   :  { %436 = vmatpush.bf16.msra.mxu1 %v2309_v34  ;;  %455 = vmatpush.bf16.msra.mxu2 %v2313_v35  ;;  %v2301_v44 = vor.u32 %v2646_v42, %v2300_v41  ;;  %v2280_v45 = vld [vmem:[#allocation7 + $0x78] sm:$0xf]  ;;  %v2642_v46 = vld [vmem:[#allocation7 + $0x80] sm:$0xf0]  ;;  %v2282_v49 = vld [vmem:[#allocation7 + $0x84] sm:$0xf0] }
  0x28   :  { %v2748_v5 = vpop.eup %2747  ;;  %v2281_v48 = vor.u32 %v2642_v46, %v2280_v45  ;;  %v2288_v50 = vld [vmem:[#allocation7 + $0x80] sm:$0xf]  ;;  %v2643_v51 = vld [vmem:[#allocation7 + $0x88] sm:$0xf0]  ;;  %v2285_v52 = vor.u32 %v2641_v47, %v2282_v49  ;;  %v2638_v56 = vld [vmem:[#allocation7 + $0x64] sm:$0xf] }
  0x29   :  { %v163_v6 = vmul.f32 128.0, %v2748_v5  ;;  %vm167_vm0 = vweird.f32 %v2748_v5  ;;  %v2289_v53 = vor.u32 %v2643_v51, %v2288_v50  ;;  %v2268_v54 = vld [vmem:[#allocation7 + $0x60] sm:$0xf]  ;;  %v2639_v55 = vld [vmem:[#allocation7 + $0x68] sm:$0xf0]  ;;  %s2202_s30 = sshll.u32 %s3554_s12, 4  ;;  %s2203_s30 = int_to_ptr.hbm [resolvable:$true] %s2202_s30 }
  0x2a   :  { %160 = vadd.xlane.f32.xlu1 %v151_v2  ;;  %156 = vadd.xlane.f32.xlu0 %v149_v3  ;;  %v2269_v57 = vor.u32 %v2639_v55, %v2268_v54  ;;  %v2270_v58 = vld [vmem:[#allocation7 + $0x6c] sm:$0xf0]  ;;  %v2276_v59 = vld [vmem:[#allocation7 + $0x68] sm:$0xf]  ;;  %v2640_v60 = vld [vmem:[#allocation7 + $0x70] sm:$0xf0] }
  0x2b   :  { %v164_v7 = vsub.f32 1.0, %v163_v6  ;;  %418 = vmatpush.bf16.msra.mxu0 %v2293_v39  ;;  %437 = vmatpush.bf16.msra.mxu1 %v2297_v43  ;;  %v2273_v61 = vor.u32 %v2638_v56, %v2270_v58  ;;  %v2277_v62 = vor.u32 %v2640_v60, %v2276_v59  ;;  %v2256_v63 = vld [vmem:[#allocation7 + $0x48] sm:$0xf]  ;;  %v2258_v4 = vld [vmem:[#allocation7 + $0x54] sm:$0xf0] }
  0x2c   :  { %456 = vmatpush.bf16.msra.mxu2 %v2301_v44  ;;  %v2637_v6 = vld [vmem:[#allocation7 + $0x58] sm:$0xf0]  ;;  %v2234_v27 = vld [vmem:[#allocation7 + $0x24] sm:$0xf0]  ;;  %v2240_v28 = vld [vmem:[#allocation7 + $0x20] sm:$0xf] }
  0x2d   :  { %v165_v8 = vmul.f32 %v2748_v5, %v164_v7  ;;  %v2631_v29 = vld [vmem:[#allocation7 + $0x28] sm:$0xf0]  ;;  %v2220_v33 = vld [vmem:[#allocation7] sm:$0xf]  ;;  %v2626_v35 = vld [vmem:[#allocation7 + $0x4] sm:$0xf] }
  0x2e   :  { %v2241_v32 = vor.u32 %v2631_v29, %v2240_v28  ;;  %v2627_v34 = vld [vmem:[#allocation7 + $0x8] sm:$0xf0]  ;;  %v2222_v39 = vld [vmem:[#allocation7 + $0xc] sm:$0xf0]  ;;  %v2228_v40 = vld [vmem:[#allocation7 + $0x8] sm:$0xf] }
  0x2f   :  { %v166_v9 = vadd.f32 %v2748_v5, %v165_v8  ;;  %419 = vmatpush.bf16.msra.mxu0 %v2281_v48  ;;  %438 = vmatpush.bf16.msra.mxu1 %v2285_v52  ;;  %v2221_v38 = vor.u32 %v2627_v34, %v2220_v33  ;;  %v2628_v41 = vld [vmem:[#allocation7 + $0x10] sm:$0xf0]  ;;  %v2225_v42 = vor.u32 %v2626_v35, %v2222_v39 }
  0x30   :  { %457 = vmatpush.bf16.msra.mxu2 %v2289_v53  ;;  %v2229_v43 = vor.u32 %v2628_v41, %v2228_v40 }
  0x31   :  { %v3183_v10 = vsel %vm167_vm0, %v2748_v5, %v166_v9  ;;  %v2264_v5 = vld [vmem:[#allocation7 + $0x50] sm:$0xf] }
  0x32   :  { %v2265_v8 = vor.u32 %v2637_v6, %v2264_v5  ;;  %v2244_v9 = vld [vmem:[#allocation7 + $0x30] sm:$0xf] }
  0x33   :  { %420 = vmatpush.bf16.msra.mxu0 %v2269_v57  ;;  %439 = vmatpush.bf16.msra.mxu1 %v2273_v61 }
  0x34   :  { %458 = vmatpush.bf16.msra.mxu2 %v2277_v62 }
  0x38   :  { %459 = vmatpush.bf16.msra.mxu2 %v2265_v8 }
  0x95   :  { %v159_v11 = vpop.xlane.xlu1 %158  ;;  %v155_v12 = vpop.xlane.xlu0 %154 }
  0x96   :  { %v171_v13 = vmul.f32 %v3183_v10, %v159_v11  ;;  %v169_v14 = vmul.f32 %v3183_v10, %v155_v12  ;;  %v2633_v11 = vld [vmem:[#allocation7 + $0x38] sm:$0xf0]  ;;  %v2632_v12 = vld [vmem:[#allocation7 + $0x34] sm:$0xf] }
  0x98   :  { %v3187_v15 = vsub.f32 %v150_v0, %v171_v13  ;;  %v3190_v16 = vsub.f32 %v3180_v1, %v169_v14  ;;  %v2636_v0 = vld [vmem:[#allocation7 + $0x50] sm:$0xf0]  ;;  %v2245_v13 = vor.u32 %v2633_v11, %v2244_v9  ;;  %v2246_v14 = vld [vmem:[#allocation7 + $0x3c] sm:$0xf0]  ;;  %v2741_v11 = vld [vmem:[#allocation5] ss:$0 sm:$0xff] }
  0x9a   :  { %v179_v17 = vmul.f32 %v3187_v15, %v3187_v15  ;;  %v177_v18 = vmul.f32 %v3190_v16, %v3190_v16 }
  0x9c   :  { %185 = vadd.xlane.f32.xlu0 %v179_v17  ;;  %181 = vadd.xlane.f32.xlu2 %v177_v18  ;;  %v2252_v17 = vld [vmem:[#allocation7 + $0x38] sm:$0xf]  ;;  %v2634_v18 = vld [vmem:[#allocation7 + $0x40] sm:$0xf0] }
  0x9d   :  { %v161_v19 = vpop.xlane.xlu1 %160  ;;  %v157_v20 = vpop.xlane.xlu0 %156 }
  0x9e   :  { %v172_v21 = vmul.f32 %v3183_v10, %v161_v19  ;;  %v170_v22 = vmul.f32 %v3183_v10, %v157_v20  ;;  %v2249_v19 = vor.u32 %v2632_v12, %v2246_v14  ;;  %v2253_v20 = vor.u32 %v2634_v18, %v2252_v17 }
  0xa0   :  { %v3198_v23 = vsub.f32 %v151_v2, %v172_v21  ;;  %v3200_v24 = vsub.f32 %v149_v3, %v170_v22  ;;  %v2635_v2 = vld [vmem:[#allocation7 + $0x4c] sm:$0xf]  ;;  %v2257_v3 = vor.u32 %v2636_v0, %v2256_v63  ;;  %460 = vmatpush.bf16.msra.mxu2 %v2253_v20  ;;  %v2232_v21 = vld [vmem:[#allocation7 + $0x18] sm:$0xf]  ;;  %v2630_v22 = vld [vmem:[#allocation7 + $0x20] sm:$0xf0] }
  0xa1   :  { %v2261_v7 = vor.u32 %v2635_v2, %v2258_v4  ;;  %v2742_v20 = vld [vmem:[%s3544_s2] ss:$0 sm:$0xff]  ;;  %s3082_s2 = smov 96  }
  0xa2   :  { %v180_v25 = vmul.f32 %v3198_v23, %v3198_v23  ;;  %v178_v26 = vmul.f32 %v3200_v24, %v3200_v24  ;;  %421 = vmatpush.bf16.msra.mxu0 %v2257_v3 }
  0xa3   :  { %440 = vmatpush.bf16.msra.mxu1 %v2261_v7 }
  0xa4   :  { %187 = vadd.xlane.f32.xlu1 %v180_v25  ;;  %183 = vadd.xlane.f32.xlu2 %v178_v26  ;;  %v2629_v25 = vld [vmem:[#allocation7 + $0x1c] sm:$0xf]  ;;  %v2233_v26 = vor.u32 %v2630_v22, %v2232_v21 }
  0xa5   :  { %v2237_v31 = vor.u32 %v2629_v25, %v2234_v27  ;;  %461 = vmatpush.bf16.msra.mxu2 %v2241_v32 }
  0xa6   :  { %422 = vmatpush.bf16.msra.mxu0 %v2245_v13 }
  0xa7   :  { %441 = vmatpush.bf16.msra.mxu1 %v2249_v19 }
  0xa9   :  { %462 = vmatpush.bf16.msra.mxu2 %v2229_v43 }
  0xaa   :  { %423 = vmatpush.bf16.msra.mxu0 %v2233_v26 }
  0xab   :  { %442 = vmatpush.bf16.msra.mxu1 %v2237_v31 }
  0xae   :  { %424 = vmatpush.bf16.msra.mxu0 %v2221_v38 }
  0xaf   :  { %443 = vmatpush.bf16.msra.mxu1 %v2225_v42 }
 0x10f   :  { %v182_v30 = vpop.xlane.xlu2 %181  ;;  %v186_v37 = vpop.xlane.xlu0 %185 }
 0x110   :  { %v189_v36 = vmul.f32 %v182_v30, %v3183_v10  ;;  %v191_v45 = vmul.f32 %v186_v37, %v3183_v10 }
 0x112   :  { %v193_v44 = vadd.f32 1e-05, %v189_v36  ;;  %v195_v46 = vadd.f32 1e-05, %v191_v45 }
 0x114   :  { %2749 = vrsqrt.f32 %v193_v44  ;;  %vm203_vm2 = vweird.f32 %v193_v44  ;;  %vm223_vm9 = vweird.f32 %v195_v46 }
 0x115   :  { %2751 = vrsqrt.f32 %v195_v46 }
 0x117   :  { %v188_v47 = vpop.xlane.xlu1 %187  ;;  %v184_v48 = vpop.xlane.xlu2 %183 }
 0x118   :  { %v192_v49 = vmul.f32 %v188_v47, %v3183_v10  ;;  %v190_v50 = vmul.f32 %v184_v48, %v3183_v10 }
 0x11a   :  { %v2750_v51 = vpop.eup %2749  ;;  %v196_v52 = vadd.f32 1e-05, %v192_v49  ;;  %v194_v53 = vadd.f32 1e-05, %v190_v50 }
 0x11b   :  { %v198_v54 = vmul.f32 %v2750_v51, %v193_v44  ;;  %v2752_v57 = vpop.eup %2751  ;;  %vm204_vm1 = vweird.f32 %v2750_v51 }
 0x11c   :  { %2753 = vrsqrt.f32 %v196_v52  ;;  %v218_v63 = vmul.f32 %v2752_v57, %v195_v46  ;;  %vm205_vm3 = vmor %vm203_vm2, %vm204_vm1  ;;  %vm213_vm5 = vweird.f32 %v194_v53  ;;  %vm233_vm7 = vweird.f32 %v196_v52 }
 0x11d   :  { %v199_v55 = vmul.f32 %v2750_v51, %v198_v54  ;;  %2755 = vrsqrt.f32 %v194_v53  ;;  %vm224_vm10 = vweird.f32 %v2752_v57 }
 0x11e   :  { %v219_v5 = vmul.f32 %v2752_v57, %v218_v63  ;;  %vm225_vm12 = vmor %vm223_vm9, %vm224_vm10 }
 0x11f   :  { %v200_v56 = vmul.f32 0.5, %v199_v55 }
 0x120   :  { %v220_v12 = vmul.f32 0.5, %v219_v5 }
 0x121   :  { %v201_v58 = vsub.f32 1.5, %v200_v56 }
 0x122   :  { %v2754_v59 = vpop.eup %2753  ;;  %v221_v21 = vsub.f32 1.5, %v220_v12 }
 0x123   :  { %v2756_v60 = vpop.eup %2755  ;;  %v228_v61 = vmul.f32 %v2754_v59, %v196_v52  ;;  %v202_v62 = vmul.f32 %v2750_v51, %v201_v58  ;;  %vm234_vm8 = vweird.f32 %v2754_v59 }
 0x124   :  { %v208_v0 = vmul.f32 %v2756_v60, %v194_v53  ;;  %vm214_vm4 = vweird.f32 %v2756_v60  ;;  %vm235_vm11 = vmor %vm233_vm7, %vm234_vm8  ;;  %v222_v27 = vmul.f32 %v2752_v57, %v221_v21 }
 0x125   :  { %v229_v2 = vmul.f32 %v2754_v59, %v228_v61  ;;  %v206_v4 = vsel %vm205_vm3, %v2750_v51, %v202_v62  ;;  %vm215_vm6 = vmor %vm213_vm5, %vm214_vm4 }
 0x126   :  { %v209_v3 = vmul.f32 %v2756_v60, %v208_v0  ;;  %v237_v9 = vmul.f32 %v206_v4, %v3190_v16 }
 0x127   :  { %v230_v7 = vmul.f32 0.5, %v229_v2 }
 0x128   :  { %v210_v6 = vmul.f32 0.5, %v209_v3  ;;  %v244_v19 = vmul.f32 %v2741_v11, %v237_v9 }
 0x129   :  { %v231_v14 = vsub.f32 1.5, %v230_v7 }
 0x12a   :  { %v211_v8 = vsub.f32 1.5, %v210_v6  ;;  %v251_v25 = vadd.f32 %v2742_v20, %v244_v19 }
 0x12b   :  { %v232_v16 = vmul.f32 %v2754_v59, %v231_v14 }
 0x12c   :  { %v212_v13 = vmul.f32 %v2756_v60, %v211_v8 }
 0x12d   :  { %v236_v29 = vsel %vm235_vm11, %v2754_v59, %v232_v16 }
 0x12e   :  { %v216_v17 = vsel %vm215_vm6, %v2756_v60, %v212_v13  ;;  %v240_v30 = vmul.f32 %v236_v29, %v3198_v23 }
 0x12f   :  { %v238_v18 = vmul.f32 %v216_v17, %v3200_v24  ;;  %v226_v24 = vsel %vm225_vm12, %v2752_v57, %v222_v27 }
 0x130   :  { %v239_v31 = vmul.f32 %v226_v24, %v3187_v15  ;;  %v247_v32 = vmul.f32 %v2741_v11, %v240_v30 }
 0x131   :  { %v245_v22 = vmul.f32 %v2741_v11, %v238_v18 }
 0x132   :  { %v246_v33 = vmul.f32 %v2741_v11, %v239_v31  ;;  %v254_v34 = vadd.f32 %v2742_v20, %v247_v32 }
 0x133   :  { %v252_v26 = vadd.f32 %v2742_v20, %v245_v22 }
 0x134   :  { %v253_v35 = vadd.f32 %v2742_v20, %v246_v33 }
 0x135   :  { %v255_v28 = vpack.c.bf16 %v252_v26, %v251_v25 }
 0x136   :  { %v256_v36 = vpack.c.bf16 %v254_v34, %v253_v35 }
 0x137   :  { %425 = vmatmul.bf16.vlgmr.msra.gmra.mxu0 %v255_v28  ;;  %444 = vmatmul.bf16.vlgmr.msra.gmra.mxu1 %v255_v28 }
 0x138   :  { %463 = vmatmul.bf16.vlgmr.msra.gmra.mxu2 %v255_v28 }
 0x147   :  { %430 = vmatmul.bf16.gmra.mxu0 %v256_v36  ;;  %449 = vmatmul.bf16.gmra.mxu1 %v256_v36 }
 0x148   :  { %468 = vmatmul.bf16.gmra.mxu2 %v256_v36 }
 0x1b4   :  { %v426_v37 = vpop.f32.mrf.mxu0  ;;  %v445_v38 = vpop.f32.mrf.mxu1 }
 0x1b5   :  { %v3217_v39 = vpack.c.bf16 %v445_v38, %v426_v37 }
 0x1b7   :  { %703 = vrot.lane.b32.xlu2 %v3217_v39, %s3082_s2  ;;  %v494_v42 = vrot.slane %v3217_v39, 4  ;;  %v498_v43 = vunpack.c.l.b16 %v3217_v39 }
 0x1b9   :  { %v501_v47 = vunpack.c.l.b16 %v494_v42 }
 0x1bb   :  { %v464_v40 = vpop.f32.mrf.mxu2 }
 0x1bc   :  { %v428_v23 = vpop.f32.mrf.mxu0  ;;  %v447_v41 = vpop.f32.mrf.mxu1  ;;  %v475_v61 = vpack.c.bf16 %v464_v40, %v464_v40 }
 0x1bd   :  { %v3221_v15 = vpack.c.bf16 %v447_v41, %v428_v23 }
 0x1be   :  { %v607_v6 = vunpack.c.l.b16 %v475_v61 }
 0x1bf   :  { %705 = vrot.lane.b32.xlu0 %v3221_v15, %s3082_s2  ;;  %v499_v44 = vunpack.c.l.b16 %v3221_v15  ;;  %v495_v45 = vrot.slane %v3221_v15, 4 }
 0x1c1   :  { %v3229_v46 = vpack.c.b16 %v499_v44, %v498_v43  ;;  %v502_v48 = vunpack.c.l.b16 %v495_v45 }
 0x1c3   :  { %v466_v49 = vpop.f32.mrf.mxu2  ;;  %715 = vrot.lane.b32.xlu1 %v3229_v46, %s3082_s2  ;;  %v503_v50 = vpack.c.b16 %v502_v48, %v501_v47 }
 0x1c4   :  { %v431_v51 = vpop.f32.mrf.mxu0  ;;  %v450_v52 = vpop.f32.mrf.mxu1  ;;  %v477_v58 = vpack.c.bf16 %v466_v49, %v466_v49 }
 0x1c5   :  { %v3233_v53 = vpack.c.bf16 %v450_v52, %v431_v51  ;;  %v509_v54 = vsel %vm504_vm13, %v503_v50, 0 }
 0x1c6   :  { %518 = vmatpush.bf16.xpose.msra.mxu3 %v509_v54  ;;  %v608_v2 = vunpack.c.l.b16 %v477_v58 }
 0x1c7   :  { %707 = vrot.lane.b32.xlu2 %v3233_v53, %s3082_s2  ;;  %v496_v60 = vrot.slane %v3233_v53, 4  ;;  %v525_v62 = vunpack.c.l.b16 %v3233_v53 }
 0x1c8   :  { %v3252_v11 = vpack.c.b16 %v608_v2, %v607_v6 }
 0x1c9   :  { %v528_v4 = vunpack.c.l.b16 %v496_v60 }
 0x1cb   :  { %v469_v55 = vpop.f32.mrf.mxu2 }
 0x1cc   :  { %v433_v56 = vpop.f32.mrf.mxu0  ;;  %v452_v57 = vpop.f32.mrf.mxu1  ;;  %v479_v13 = vpack.c.bf16 %v469_v55, %v469_v55 }
 0x1cd   :  { %v3238_v59 = vpack.c.bf16 %v452_v57, %v433_v56  ;;  %2314 = vmatmul.msk.bf16.vlgmr.msra.gmra.mxu3 %vm504_vm13, %v3229_v46 }
 0x1ce   :  { %v635_v17 = vunpack.c.l.b16 %v479_v13 }
 0x1cf   :  { %709 = vrot.lane.b32.xlu0 %v3238_v59, %s3082_s2  ;;  %v526_v63 = vunpack.c.l.b16 %v3238_v59  ;;  %v497_v0 = vrot.slane %v3238_v59, 4 }
 0x1d1   :  { %v3248_v3 = vpack.c.b16 %v526_v63, %v525_v62  ;;  %v529_v5 = vunpack.c.l.b16 %v497_v0 }
 0x1d3   :  { %v471_v7 = vpop.f32.mrf.mxu2  ;;  %740 = vrot.lane.b32.xlu2 %v3248_v3, %s3082_s2  ;;  %v530_v8 = vpack.c.b16 %v529_v5, %v528_v4 }
 0x1d4   :  { %v481_v9 = vpack.c.bf16 %v471_v7, %v471_v7 }
 0x1d5   :  { %v535_v12 = vsel %vm504_vm13, %v530_v8, 0 }
 0x1d6   :  { %544 = vmatpush.bf16.xpose.msrb.mxu3 %v535_v12  ;;  %v636_v14 = vunpack.c.l.b16 %v481_v9 }
 0x1d8   :  { %v3256_v18 = vpack.c.b16 %v636_v14, %v635_v17 }
 0x1dd   :  { %2315 = vmatmul.msk.bf16.vlgmr.msrb.gmra.mxu3 %vm504_vm13, %v3248_v3 }
 0x1de   :  { %621 = vmatpush.bf16.msra.mxu3 %v3252_v11 }
 0x1e2   :  { %649 = vmatpush.bf16.msrb.mxu3 %v3256_v18 }
 0x211   :  { %v704_v19 = vpop.permute.xlu2 %703 }
 0x212   :  { %v711_v20 = vrot.slane %v704_v19, 4 }
 0x214   :  { %v717_v16 = vunpack.c.l.b16 %v711_v20 }
 0x221   :  { %v708_v28 = vpop.permute.xlu2 %707 }
 0x222   :  { %v713_v24 = vrot.slane %v708_v28, 4 }
 0x224   :  { %v742_v32 = vunpack.c.l.b16 %v713_v24 }
 0x22d   :  { %v741_v36 = vpop.permute.xlu2 %740 }
 0x231   :  { %v706_v21 = vpop.permute.xlu0 %705 }
 0x232   :  { %v712_v22 = vrot.slane %v706_v21, 4 }
 0x234   :  { %v718_v25 = vunpack.c.l.b16 %v712_v22 }
 0x235   :  { %v716_v29 = vpop.permute.xlu1 %715 }
 0x236   :  { %v719_v26 = vpack.c.b16 %v718_v25, %v717_v16 }
 0x238   :  { %v724_v27 = vsel %vm504_vm13, %v719_v26, 0 }
 0x239   :  { %733 = vmatpush.bf16.xpose.msrb.mxu1 %v724_v27 }
 0x240   :  { %2328 = vmatmul.msk.bf16.vlgmr.msrb.gmra.mxu1 %vm504_vm13, %v716_v29 }
 0x241   :  { %v710_v30 = vpop.permute.xlu0 %709 }
 0x242   :  { %v714_v31 = vrot.slane %v710_v30, 4 }
 0x244   :  { %v743_v33 = vunpack.c.l.b16 %v714_v31 }
 0x246   :  { %v744_v34 = vpack.c.b16 %v743_v33, %v742_v32 }
 0x248   :  { %v749_v35 = vsel %vm504_vm13, %v744_v34, 0 }
 0x249   :  { %758 = vmatpush.bf16.xpose.msrb.mxu2 %v749_v35 }
 0x250   :  { %v520_v37 = vpop.f32.mrf.mxu3  ;;  %2329 = vmatmul.msk.bf16.vlgmr.msrb.gmra.mxu2 %vm504_vm13, %v741_v36 }
 0x251   :  { %v552_v38 = vsel %vm551_vm14, %v520_v37, -inf }
 0x252   :  { %553 = vmax.xlane.f32.xlu1 %v552_v38 }
 0x258   :  { %v522_v40 = vpop.f32.mrf.mxu3 }
 0x259   :  { %v555_v23 = vsel %vm551_vm14, %v522_v40, -inf }
 0x25a   :  { %556 = vmax.xlane.f32.xlu0 %v555_v23 }
 0x260   :  { %v546_v41 = vpop.f32.mrf.mxu3 }
 0x261   :  { %v558_v42 = vsel %vm551_vm14, %v546_v41, -inf }
 0x262   :  { %559 = vmax.xlane.f32.xlu2 %v558_v42 }
 0x268   :  { %v548_v43 = vpop.f32.mrf.mxu3 }
 0x269   :  { %v561_v44 = vsel %vm551_vm14, %v548_v43, -inf }
 0x26a   :  { %562 = vmax.xlane.f32.xlu1 %v561_v44 }
 0x2bd   :  { %v735_v45 = vpop.f32.mrf.mxu1 }
 0x2be   :  { %v765_v47 = vsel %vm551_vm14, %v735_v45, -inf }
 0x2bf   :  { %766 = vmax.xlane.f32.xlu0 %v765_v47 }
 0x2c5   :  { %v554_v48 = vpop.xlane.xlu1 %553  ;;  %v737_v49 = vpop.f32.mrf.mxu1 }
 0x2c6   :  { %v564_v50 = vsub.f32 %v520_v37, %v554_v48  ;;  %v768_v51 = vsel %vm551_vm14, %v737_v49, -inf }
 0x2c7   :  { %769 = vmax.xlane.f32.xlu2 %v768_v51 }
 0x2c8   :  { %v568_v52 = vmul.f32 1.442695, %v564_v50 }
 0x2ca   :  { %2757 = vpow2.f32 %v568_v52 }
 0x2cd   :  { %v557_v54 = vpop.xlane.xlu0 %556 }
 0x2ce   :  { %v565_v55 = vsub.f32 %v522_v40, %v557_v54 }
 0x2d0   :  { %v2758_v56 = vpop.eup %2757  ;;  %v570_v57 = vmul.f32 1.442695, %v565_v55 }
 0x2d1   :  { %v576_v58 = vsel %vm551_vm14, %v2758_v56, 0.0 }
 0x2d2   :  { %2759 = vpow2.f32 %v570_v57  ;;  %577 = vadd.xlane.f32.xlu1 %v576_v58 }
 0x2d3   :  { %v760_v12 = vpop.f32.mrf.mxu2 }
 0x2d4   :  { %v771_v13 = vsel %vm551_vm14, %v760_v12, -inf }
 0x2d5   :  { %v560_v60 = vpop.xlane.xlu2 %559 }
 0x2d6   :  { %v566_v61 = vsub.f32 %v546_v41, %v560_v60 }
 0x2d8   :  { %v2760_v62 = vpop.eup %2759  ;;  %v572_v63 = vmul.f32 1.442695, %v566_v61 }
 0x2d9   :  { %v579_v0 = vsel %vm551_vm14, %v2760_v62, 0.0 }
 0x2da   :  { %2761 = vpow2.f32 %v572_v63  ;;  %580 = vadd.xlane.f32.xlu0 %v579_v0 }
 0x2db   :  { %v762_v51 = vpop.f32.mrf.mxu2 }
 0x2dc   :  { %v774_v52 = vsel %vm551_vm14, %v762_v51, -inf }
 0x2dd   :  { %v563_v2 = vpop.xlane.xlu1 %562 }
 0x2de   :  { %v567_v4 = vsub.f32 %v548_v43, %v563_v2  ;;  %v2651_v2 = vld [vmem:[#allocation8 + $0x8] sm:$0xff] }
 0x2df   :  { %686 = vmatpush.bf16.msrb.mxu0 %v2651_v2 }
 0x2e0   :  { %v2762_v5 = vpop.eup %2761  ;;  %v574_v6 = vmul.f32 1.442695, %v567_v4 }
 0x2e1   :  { %v582_v7 = vsel %vm551_vm14, %v2762_v5, 0.0 }
 0x2e2   :  { %2763 = vpow2.f32 %v574_v6  ;;  %583 = vadd.xlane.f32.xlu2 %v582_v7 }
 0x2e8   :  { %v2764_v8 = vpop.eup %2763 }
 0x2e9   :  { %v585_v9 = vsel %vm551_vm14, %v2764_v8, 0.0 }
 0x2ea   :  { %586 = vadd.xlane.f32.xlu1 %v585_v9 }
 0x2ee   :  { %910 = vrot.lane.b32.xlu0 %v3217_v39, %s3068_s13 }
 0x303   :  { %818 = vrot.lane.b32.xlu1 %v3252_v11, %s3082_s2 }
 0x32d   :  { %772 = vmax.xlane.f32.xlu1 %v771_v13 }
 0x332   :  { %v767_v14 = vpop.xlane.xlu0 %766 }
 0x333   :  { %v777_v17 = vsub.f32 %v735_v45, %v767_v14 }
 0x335   :  { %v781_v19 = vmul.f32 1.442695, %v777_v17 }
 0x337   :  { %2765 = vpow2.f32 %v781_v19 }
 0x33a   :  { %v770_v20 = vpop.xlane.xlu2 %769 }
 0x33b   :  { %v778_v21 = vsub.f32 %v737_v49, %v770_v20  ;;  %v2650_v20 = vld [vmem:[#allocation8] sm:$0xff] }
 0x33c   :  { %687 = vmatpush.bf16.msrb.mxu0 %v2650_v20 }
 0x33d   :  { %v2766_v22 = vpop.eup %2765  ;;  %v783_v16 = vmul.f32 1.442695, %v778_v21 }
 0x33e   :  { %v789_v25 = vsel %vm551_vm14, %v2766_v22, 0.0 }
 0x33f   :  { %2767 = vpow2.f32 %v783_v16  ;;  %790 = vadd.xlane.f32.xlu0 %v789_v25 }
 0x345   :  { %v3281_v26 = vpop.eup %2767  ;;  %v578_v27 = vpop.xlane.xlu1 %577 }
 0x346   :  { %v792_v28 = vsel %vm551_vm14, %v3281_v26, 0.0  ;;  %2769 = vrcp.f32 %v578_v27 }
 0x347   :  { %793 = vadd.xlane.f32.xlu2 %v792_v28 }
 0x34c   :  { %v2770_v24 = vpop.eup %2769 }
 0x34d   :  { %v581_v29 = vpop.xlane.xlu0 %580  ;;  %v592_v30 = vmul.f32 %v2770_v24, %v2758_v56 }
 0x34e   :  { %2771 = vrcp.f32 %v581_v29 }
 0x34f   :  { %v596_v32 = vpack.c.bf16 %v592_v30, %v592_v30 }
 0x351   :  { %v602_v36 = vunpack.c.l.b16 %v596_v32 }
 0x353   :  { %922 = vrot.lane.b32.xlu0 %v3229_v46, %s3068_s13 }
 0x354   :  { %v2772_v31 = vpop.eup %2771 }
 0x355   :  { %v593_v33 = vmul.f32 %v2772_v31, %v2760_v62  ;;  %v584_v34 = vpop.xlane.xlu2 %583 }
 0x356   :  { %2773 = vrcp.f32 %v584_v34 }
 0x357   :  { %v597_v35 = vpack.c.bf16 %v593_v33, %v593_v33 }
 0x359   :  { %v603_v37 = vunpack.c.l.b16 %v597_v35 }
 0x35b   :  { %v604_v38 = vpack.c.b16 %v603_v37, %v602_v36  ;;  %v2653_v37 = vld [vmem:[#allocation8 + $0x18] sm:$0xff] }
 0x35c   :  { %v2774_v23 = vpop.eup %2773  ;;  %893 = vmatpush.bf16.msra.mxu2 %v2653_v37 }
 0x35d   :  { %v587_v40 = vpop.xlane.xlu1 %586  ;;  %2316 = vmatmul.msk.bf16.vlgmr.msra.gmra.mxu3 %vm551_vm14, %v604_v38  ;;  %v594_v41 = vmul.f32 %v2774_v23, %v2762_v5  ;;  %v2652_v38 = vld [vmem:[#allocation8 + $0x10] sm:$0xff] }
 0x35e   :  { %2775 = vrcp.f32 %v587_v40 }
 0x35f   :  { %912 = vrot.lane.b32.xlu2 %v3221_v15, %s3068_s13  ;;  %v598_v43 = vpack.c.bf16 %v594_v41, %v594_v41 }
 0x360   :  { %v911_v57 = vpop.permute.xlu0 %910  ;;  %894 = vmatpush.bf16.msra.mxu2 %v2652_v38 }
 0x361   :  { %v630_v47 = vunpack.c.l.b16 %v598_v43  ;;  %v918_v5 = vrot.slane %v911_v57, 4 }
 0x364   :  { %v2776_v42 = vpop.eup %2775 }
 0x365   :  { %v595_v44 = vmul.f32 %v2776_v42, %v2764_v8 }
 0x367   :  { %v599_v45 = vpack.c.bf16 %v595_v44, %v595_v44 }
 0x369   :  { %v631_v48 = vunpack.c.l.b16 %v599_v45 }
 0x36b   :  { %v632_v49 = vpack.c.b16 %v631_v48, %v630_v47 }
 0x36d   :  { %2317 = vmatmul.msk.bf16.vlgmr.msrb.gmra.mxu3 %vm551_vm14, %v632_v49 }
 0x375   :  { %v819_v50 = vpop.permute.xlu1 %818 }
 0x376   :  { %831 = vmatpush.bf16.msra.mxu3 %v819_v50 }
 0x388   :  { %775 = vmax.xlane.f32.xlu2 %v774_v52 }
 0x3a0   :  { %v773_v54 = vpop.xlane.xlu1 %772  ;;  %843 = vrot.lane.b32.xlu2 %v3256_v18, %s3082_s2 }
 0x3a1   :  { %v779_v55 = vsub.f32 %v760_v12, %v773_v54  ;;  %v924_v12 = vunpack.c.l.b16 %v918_v5 }
 0x3a3   :  { %v785_v56 = vmul.f32 1.442695, %v779_v55 }
 0x3a5   :  { %2777 = vpow2.f32 %v785_v56 }
 0x3a8   :  { %1025 = vrot.lane.b32.xlu2 %v3252_v11, %s3068_s13 }
 0x3ab   :  { %v3296_v58 = vpop.eup %2777 }
 0x3ac   :  { %v795_v60 = vsel %vm551_vm14, %v3296_v58, 0.0 }
 0x3ad   :  { %796 = vadd.xlane.f32.xlu0 %v795_v60 }
 0x3b0   :  { %947 = vrot.lane.b32.xlu2 %v3248_v3, %s3068_s13 }
 0x3b2   :  { %v791_v61 = vpop.xlane.xlu0 %790 }
 0x3b3   :  { %2779 = vrcp.f32 %v791_v61 }
 0x3b8   :  { %1119 = vrot.lane.b32.xlu2 %v3221_v15, %s3083_s14 }
 0x3b9   :  { %v2780_v63 = vpop.eup %2779 }
 0x3ba   :  { %v794_v62 = vpop.xlane.xlu2 %793  ;;  %v805_v0 = vmul.f32 %v2780_v63, %v2766_v22 }
 0x3bb   :  { %2781 = vrcp.f32 %v794_v62 }
 0x3bc   :  { %v809_v6 = vpack.c.bf16 %v805_v0, %v805_v0 }
 0x3be   :  { %v815_v14 = vunpack.c.l.b16 %v809_v6 }
 0x3c0   :  { %1123 = vrot.lane.b32.xlu2 %v3238_v59, %s3083_s14 }
 0x3c1   :  { %v2782_v4 = vpop.eup %2781  ;;  %914 = vrot.lane.b32.xlu0 %v3233_v53, %s3068_s13 }
 0x3c2   :  { %v806_v7 = vmul.f32 %v2782_v4, %v3281_v26  ;;  %v913_v8 = vpop.permute.xlu2 %912 }
 0x3c3   :  { %v919_v9 = vrot.slane %v913_v8, 4 }
 0x3c4   :  { %v810_v15 = vpack.c.bf16 %v806_v7, %v806_v7 }
 0x3c5   :  { %v925_v13 = vunpack.c.l.b16 %v919_v9  ;;  %v923_v16 = vpop.permute.xlu0 %922 }
 0x3c6   :  { %v816_v17 = vunpack.c.l.b16 %v810_v15 }
 0x3c7   :  { %v926_v19 = vpack.c.b16 %v925_v13, %v924_v12 }
 0x3c8   :  { %v817_v21 = vpack.c.b16 %v816_v17, %v815_v14 }
 0x3c9   :  { %v931_v22 = vsel %vm504_vm13, %v926_v19, 0 }
 0x3ca   :  { %2330 = vmatmul.msk.bf16.vlgmr.msra.gmra.mxu3 %vm551_vm14, %v817_v21 }
 0x3cb   :  { %940 = vmatpush.bf16.xpose.msrb.mxu3 %v931_v22 }
 0x3da   :  { %2342 = vmatmul.msk.bf16.vlgmr.msrb.gmra.mxu3 %vm504_vm13, %v923_v16 }
 0x3e0   :  { %v623_v25 = vpop.f32.mrf.mxu3 }
 0x3e8   :  { %v625_v26 = vpop.f32.mrf.mxu3 }
 0x3e9   :  { %v656_v27 = vpack.c.bf16 %v625_v26, %v623_v25 }
 0x3eb   :  { %2326 = vmatmul.msk.bf16.vlgmr.msrb.gmra.mxu0 %vm504_vm13, %v656_v27 }
 0x3f0   :  { %v651_v28 = vpop.f32.mrf.mxu3 }
 0x3f8   :  { %v653_v29 = vpop.f32.mrf.mxu3 }
 0x3f9   :  { %v657_v24 = vpack.c.bf16 %v653_v29, %v651_v28 }
 0x3fb   :  { %v776_v30 = vpop.xlane.xlu2 %775  ;;  %2327 = vmatmul.msk.bf16.gmra.mxu0 %vm504_vm13, %v657_v24 }
 0x3fc   :  { %v780_v31 = vsub.f32 %v762_v51, %v776_v30 }
 0x3fe   :  { %v787_v32 = vmul.f32 1.442695, %v780_v31 }
 0x400   :  { %2783 = vpow2.f32 %v787_v32 }
 0x403   :  { %v844_v33 = vpop.permute.xlu2 %843 }
 0x404   :  { %856 = vmatpush.bf16.msra.mxu1 %v844_v33 }
 0x406   :  { %v2784_v34 = vpop.eup %2783 }
 0x407   :  { %v798_v35 = vsel %vm551_vm14, %v2784_v34, 0.0 }
 0x408   :  { %799 = vadd.xlane.f32.xlu1 %v798_v35 }
 0x40b   :  { %v1026_v36 = vpop.permute.xlu2 %1025 }
 0x40c   :  { %1038 = vmatpush.bf16.msrb.mxu1 %v1026_v36 }
 0x413   :  { %v948_v0 = vpop.permute.xlu2 %947 }
 0x41b   :  { %v1120_v13 = vpop.permute.xlu2 %1119 }
 0x41c   :  { %v1126_v14 = vrot.slane %v1120_v13, 4 }
 0x41e   :  { %v1132_v21 = vunpack.c.l.b16 %v1126_v14 }
 0x420   :  { %v797_v47 = vpop.xlane.xlu0 %796 }
 0x421   :  { %2785 = vrcp.f32 %v797_v47 }
 0x427   :  { %v2786_v49 = vpop.eup %2785 }
 0x428   :  { %v807_v50 = vmul.f32 %v2786_v49, %v3296_v58 }
 0x42a   :  { %v811_v52 = vpack.c.bf16 %v807_v50, %v807_v50 }
 0x42c   :  { %v840_v56 = vunpack.c.l.b16 %v811_v52 }
 0x433   :  { %v915_v61 = vpop.permute.xlu0 %914 }
 0x434   :  { %v920_v26 = vrot.slane %v915_v61, 4 }
 0x436   :  { %v949_v29 = vunpack.c.l.b16 %v920_v26 }
 0x44d   :  { %v833_v40 = vpop.f32.mrf.mxu3 }
 0x455   :  { %v835_v23 = vpop.f32.mrf.mxu3 }
 0x456   :  { %v863_v41 = vpack.c.bf16 %v835_v23, %v833_v40  ;;  %v1124_v40 = vpop.permute.xlu2 %1123 }
 0x458   :  { %2340 = vmatmul.msk.bf16.vlgmr.msra.gmra.mxu2 %vm504_vm13, %v863_v41 }
 0x45d   :  { %v942_v42 = vpop.f32.mrf.mxu3 }
 0x45e   :  { %v972_v43 = vsel %vm551_vm14, %v942_v42, -inf }
 0x45f   :  { %973 = vmax.xlane.f32.xlu0 %v972_v43 }
 0x465   :  { %v944_v44 = vpop.f32.mrf.mxu3 }
 0x466   :  { %v975_v45 = vsel %vm551_vm14, %v944_v44, -inf }
 0x467   :  { %976 = vmax.xlane.f32.xlu1 %v975_v45 }
 0x468   :  { %v689_v2 = vpop.f32.mrf.mxu0 }
 0x470   :  { %v3345_v23 = vpop.f32.mrf.mxu0 }
 0x473   :  { %1117 = vrot.lane.b32.xlu0 %v3217_v39, %s3083_s14  ;;  %v3327_v39 = vld [vmem:[%s3547_s5] ss:$0 sm:$0xff] }
 0x478   :  { %v694_v52 = vpop.f32.mrf.mxu0 }
 0x47b   :  { %v800_v48 = vpop.xlane.xlu1 %799 }
 0x47c   :  { %2787 = vrcp.f32 %v800_v48 }
 0x480   :  { %916 = vrot.lane.b32.xlu1 %v3238_v59, %s3068_s13  ;;  %v486_v59 = vadd.f32 %v3327_v39, %v3180_v1 }
 0x482   :  { %v2788_v51 = vpop.eup %2787  ;;  %v699_v4 = vadd.f32 %v689_v2, %v486_v59  ;;  %v2861_v59 = vld [vmem:[#allocation2 + $0x10] sm:$0xff] }
 0x483   :  { %v808_v54 = vmul.f32 %v2788_v51, %v2784_v34 }
 0x485   :  { %v812_v55 = vpack.c.bf16 %v808_v54, %v808_v54 }
 0x487   :  { %v841_v57 = vunpack.c.l.b16 %v812_v55 }
 0x489   :  { %v842_v60 = vpack.c.b16 %v841_v57, %v840_v56  ;;  %v3349_v56 = vpop.f32.mrf.mxu0 }
 0x48b   :  { %2331 = vmatmul.msk.bf16.vlgmr.msra.gmra.mxu1 %vm551_vm14, %v842_v60 }
 0x4d2   :  { %v974_v62 = vpop.xlane.xlu0 %973 }
 0x4d3   :  { %v984_v58 = vsub.f32 %v942_v42, %v974_v62  ;;  %v1128_v42 = vrot.slane %v1124_v40, 4 }
 0x4d5   :  { %v988_v63 = vmul.f32 1.442695, %v984_v58  ;;  %v1157_v48 = vunpack.c.l.b16 %v1128_v42 }
 0x4d7   :  { %2789 = vpow2.f32 %v988_v63 }
 0x4da   :  { %v977_v5 = vpop.xlane.xlu1 %976 }
 0x4db   :  { %v985_v6 = vsub.f32 %v944_v44, %v977_v5  ;;  %v896_v7 = vpop.f32.mrf.mxu2 }
 0x4dc   :  { %v3331_v8 = vadd.f32 %v896_v7, %v699_v4  ;;  %v2654_v7 = vld [vmem:[#allocation8 + $0x20] sm:$0xff] }
 0x4dd   :  { %v2790_v9 = vpop.eup %2789  ;;  %v990_v15 = vmul.f32 1.442695, %v985_v6  ;;  %v2655_v6 = vld [vmem:[#allocation8 + $0x28] sm:$0xff] }
 0x4de   :  { %v996_v12 = vsel %vm551_vm14, %v2790_v9, 0.0 }
 0x4df   :  { %2791 = vpow2.f32 %v990_v15  ;;  %997 = vadd.xlane.f32.xlu0 %v996_v12 }
 0x4e3   :  { %v3355_v63 = vpop.f32.mrf.mxu2 }
 0x4e5   :  { %v2792_v17 = vpop.eup %2791  ;;  %v1118_v19 = vpop.permute.xlu0 %1117 }
 0x4e6   :  { %v1125_v1 = vrot.slane %v1118_v19, 4  ;;  %v999_v20 = vsel %vm551_vm14, %v2792_v17, 0.0 }
 0x4e7   :  { %1000 = vadd.xlane.f32.xlu1 %v999_v20 }
 0x4e8   :  { %v1131_v22 = vunpack.c.l.b16 %v1125_v1 }
 0x4ea   :  { %v1133_v16 = vpack.c.b16 %v1132_v21, %v1131_v22 }
 0x4ec   :  { %v1138_v25 = vsel %vm504_vm13, %v1133_v16, 0 }
 0x4ed   :  { %1147 = vmatpush.bf16.xpose.msra.mxu1 %v1138_v25 }
 0x4f2   :  { %v917_v27 = vpop.permute.xlu1 %916 }
 0x4f3   :  { %v921_v28 = vrot.slane %v917_v27, 4  ;;  %1121 = vrot.lane.b32.xlu0 %v3233_v53, %s3083_s14 }
 0x4f5   :  { %v950_v24 = vunpack.c.l.b16 %v921_v28 }
 0x4f7   :  { %v951_v30 = vpack.c.b16 %v950_v24, %v949_v29 }
 0x4f9   :  { %v956_v31 = vsel %vm504_vm13, %v951_v30, 0 }
 0x4fa   :  { %965 = vmatpush.bf16.xpose.msra.mxu0 %v956_v31 }
 0x500   :  { %1129 = vrot.lane.b32.xlu1 %v3229_v46, %s3083_s14 }
 0x501   :  { %2343 = vmatmul.msk.bf16.vlgmr.msra.gmra.mxu0 %vm504_vm13, %v948_v0  ;;  %v488_v0 = vadd.f32 %v2861_v59, %v3327_v39 }
 0x502   :  { %1100 = vmatpush.bf16.msrb.mxu0 %v2655_v6 }
 0x503   :  { %v701_v2 = vadd.f32 %v694_v52, %v488_v0 }
 0x506   :  { %1101 = vmatpush.bf16.msrb.mxu0 %v2654_v7 }
 0x508   :  { %1154 = vrot.lane.b32.xlu1 %v3248_v3, %s3083_s14  ;;  %v858_v32 = vpop.f32.mrf.mxu1 }
 0x510   :  { %v860_v33 = vpop.f32.mrf.mxu1 }
 0x511   :  { %v864_v34 = vpack.c.bf16 %v860_v33, %v858_v32 }
 0x513   :  { %2341 = vmatmul.msk.bf16.gmra.mxu2 %vm504_vm13, %v864_v34 }
 0x552   :  { %v998_v53 = vpop.xlane.xlu0 %997 }
 0x553   :  { %2793 = vrcp.f32 %v998_v53 }
 0x559   :  { %v2794_v36 = vpop.eup %2793 }
 0x55a   :  { %v1001_v35 = vpop.xlane.xlu1 %1000  ;;  %v1012_v37 = vmul.f32 %v2794_v36, %v2790_v9 }
 0x55b   :  { %2795 = vrcp.f32 %v1001_v35 }
 0x55c   :  { %v1016_v46 = vpack.c.bf16 %v1012_v37, %v1012_v37 }
 0x55e   :  { %v1022_v44 = vunpack.c.l.b16 %v1016_v46 }
 0x561   :  { %v2796_v38 = vpop.eup %2795 }
 0x562   :  { %v1013_v41 = vmul.f32 %v2796_v38, %v2792_v17 }
 0x564   :  { %v1017_v43 = vpack.c.bf16 %v1013_v41, %v1013_v41 }
 0x565   :  { %v1122_v3 = vpop.permute.xlu0 %1121 }
 0x566   :  { %v1023_v45 = vunpack.c.l.b16 %v1017_v43  ;;  %v1127_v47 = vrot.slane %v1122_v3, 4 }
 0x568   :  { %v1024_v49 = vpack.c.b16 %v1023_v45, %v1022_v44  ;;  %v1156_v50 = vunpack.c.l.b16 %v1127_v47 }
 0x56a   :  { %v1158_v51 = vpack.c.b16 %v1157_v48, %v1156_v50  ;;  %2344 = vmatmul.msk.bf16.vlgmr.msrb.gmra.mxu1 %vm551_vm14, %v1024_v49 }
 0x56c   :  { %v1163_v54 = vsel %vm504_vm13, %v1158_v51, 0 }
 0x56d   :  { %1172 = vmatpush.bf16.xpose.msrb.mxu2 %v1163_v54 }
 0x572   :  { %v1130_v55 = vpop.permute.xlu1 %1129 }
 0x57a   :  { %v1155_v57 = vpop.permute.xlu1 %1154  ;;  %2356 = vmatmul.msk.bf16.vlgmr.msra.gmra.mxu1 %vm504_vm13, %v1130_v55 }
 0x57b   :  { %2357 = vmatmul.msk.bf16.vlgmr.msrb.gmra.mxu2 %vm504_vm13, %v1155_v57 }
 0x57e   :  { %v967_v60 = vpop.f32.mrf.mxu0 }
 0x57f   :  { %v978_v61 = vsel %vm551_vm14, %v967_v60, -inf }
 0x580   :  { %979 = vmax.xlane.f32.xlu0 %v978_v61 }
 0x586   :  { %v969_v62 = vpop.f32.mrf.mxu0 }
 0x587   :  { %v981_v58 = vsel %vm551_vm14, %v969_v62, -inf }
 0x588   :  { %982 = vmax.xlane.f32.xlu2 %v981_v58 }
 0x596   :  { %v901_v4 = vpop.f32.mrf.mxu2 }
 0x597   :  { %v3358_v5 = vadd.f32 %v901_v4, %v701_v2 }
 0x59e   :  { %v3361_v14 = vpop.f32.mrf.mxu2 }
 0x5e7   :  { %v1040_v9 = vpop.f32.mrf.mxu1 }
 0x5ef   :  { %v1042_v15 = vpop.f32.mrf.mxu1 }
 0x5f0   :  { %v1070_v12 = vpack.c.bf16 %v1042_v15, %v1040_v9 }
 0x5f2   :  { %2354 = vmatmul.msk.bf16.vlgmr.msrb.gmra.mxu0 %vm504_vm13, %v1070_v12 }
 0x5f3   :  { %v980_v13 = vpop.xlane.xlu0 %979 }
 0x5f4   :  { %v986_v17 = vsub.f32 %v967_v60, %v980_v13 }
 0x5f6   :  { %v992_v20 = vmul.f32 1.442695, %v986_v17 }
 0x5f7   :  { %v1149_v19 = vpop.f32.mrf.mxu1 }
 0x5f8   :  { %v1179_v1 = vsel %vm551_vm14, %v1149_v19, -inf  ;;  %2797 = vpow2.f32 %v992_v20 }
 0x5f9   :  { %1180 = vmax.xlane.f32.xlu1 %v1179_v1 }
 0x5fb   :  { %v983_v21 = vpop.xlane.xlu2 %982 }
 0x5fc   :  { %v987_v22 = vsub.f32 %v969_v62, %v983_v21 }
 0x5fe   :  { %v994_v16 = vmul.f32 1.442695, %v987_v22  ;;  %v1174_v25 = vpop.f32.mrf.mxu2  ;;  %v2798_v29 = vpop.eup %2797 }
 0x5ff   :  { %v1151_v26 = vpop.f32.mrf.mxu1  ;;  %v1185_v27 = vsel %vm551_vm14, %v1174_v25, -inf  ;;  %v1002_v33 = vsel %vm551_vm14, %v2798_v29, 0.0 }
 0x600   :  { %2799 = vpow2.f32 %v994_v16  ;;  %1186 = vmax.xlane.f32.xlu2 %v1185_v27  ;;  %v1182_v28 = vsel %vm551_vm14, %v1151_v26, -inf }
 0x601   :  { %1183 = vmax.xlane.f32.xlu0 %v1182_v28 }
 0x606   :  { %v2800_v24 = vpop.eup %2799  ;;  %v1176_v30 = vpop.f32.mrf.mxu2 }
 0x607   :  { %v1005_v31 = vsel %vm551_vm14, %v2800_v24, 0.0  ;;  %v1188_v32 = vsel %vm551_vm14, %v1176_v30, -inf }
 0x608   :  { %1006 = vadd.xlane.f32.xlu2 %v1005_v31  ;;  %1189 = vmax.xlane.f32.xlu1 %v1188_v32 }
 0x609   :  { %1003 = vadd.xlane.f32.xlu0 %v1002_v33 }
 0x621   :  { %1050 = vrot.lane.b32.xlu1 %v3256_v18, %s3068_s13 }
 0x629   :  { %1257 = vrot.lane.b32.xlu1 %v3256_v18, %s3083_s14 }
 0x66c   :  { %v1181_v34 = vpop.xlane.xlu1 %1180 }
 0x66d   :  { %v1191_v53 = vsub.f32 %v1149_v19, %v1181_v34 }
 0x66f   :  { %v1195_v35 = vmul.f32 1.442695, %v1191_v53 }
 0x671   :  { %2801 = vpow2.f32 %v1195_v35 }
 0x673   :  { %v1187_v36 = vpop.xlane.xlu2 %1186 }
 0x674   :  { %v1184_v37 = vpop.xlane.xlu0 %1183  ;;  %v1193_v40 = vsub.f32 %v1174_v25, %v1187_v36  ;;  %v2657_v36 = vld [vmem:[#allocation8 + $0x38] sm:$0xff] }
 0x675   :  { %v1192_v38 = vsub.f32 %v1151_v26, %v1184_v37  ;;  %1307 = vmatpush.bf16.msra.mxu2 %v2657_v36  ;;  %v2656_v37 = vld [vmem:[#allocation8 + $0x30] sm:$0xff] }
 0x676   :  { %v1199_v43 = vmul.f32 1.442695, %v1193_v40 }
 0x677   :  { %v2802_v46 = vpop.eup %2801  ;;  %v1197_v41 = vmul.f32 1.442695, %v1192_v38 }
 0x678   :  { %v1203_v42 = vsel %vm551_vm14, %v2802_v46, 0.0 }
 0x679   :  { %2803 = vpow2.f32 %v1197_v41  ;;  %1204 = vadd.xlane.f32.xlu0 %v1203_v42  ;;  %1308 = vmatpush.bf16.msra.mxu2 %v2656_v37  ;;  %v2470_v37 = vld [vmem:[#allocation11 + $0xd0] sm:$0xf0] }
 0x67a   :  { %2805 = vpow2.f32 %v1199_v43 }
 0x67b   :  { %v1007_v3 = vpop.xlane.xlu2 %1006  ;;  %v1190_v44 = vpop.xlane.xlu1 %1189 }
 0x67c   :  { %v1004_v45 = vpop.xlane.xlu0 %1003  ;;  %2807 = vrcp.f32 %v1007_v3  ;;  %v1194_v47 = vsub.f32 %v1176_v30, %v1190_v44  ;;  %v1103_v3 = vpop.f32.mrf.mxu0  ;;  %v2862_v44 = vld [vmem:[#allocation2 + $0x8] sm:$0xff] }
 0x67d   :  { %2809 = vrcp.f32 %v1004_v45  ;;  %v487_v45 = vadd.f32 %v2862_v44, %v3327_v39  ;;  %v2452_v44 = vld [vmem:[#allocation11 + $0xa0] sm:$0xf] }
 0x67e   :  { %v1201_v49 = vmul.f32 1.442695, %v1194_v47 }
 0x67f   :  { %v2804_v18 = vpop.eup %2803 }
 0x680   :  { %v1206_v48 = vsel %vm551_vm14, %v2804_v18, 0.0  ;;  %v2806_v50 = vpop.eup %2805  ;;  %2811 = vpow2.f32 %v1201_v49 }
 0x681   :  { %1207 = vadd.xlane.f32.xlu2 %v1206_v48  ;;  %v1209_v54 = vsel %vm551_vm14, %v2806_v50, 0.0 }
 0x682   :  { %v2808_v51 = vpop.eup %2807 }
 0x683   :  { %v2810_v52 = vpop.eup %2809  ;;  %v1015_v55 = vmul.f32 %v2808_v51, %v2800_v24 }
 0x684   :  { %v1014_v57 = vmul.f32 %v2810_v52, %v2798_v29  ;;  %v1105_v49 = vpop.f32.mrf.mxu0 }
 0x685   :  { %v1019_v61 = vpack.c.bf16 %v1015_v55, %v1015_v55 }
 0x686   :  { %v2812_v60 = vpop.eup %2811  ;;  %v1018_v62 = vpack.c.bf16 %v1014_v57, %v1014_v57 }
 0x687   :  { %v1212_v58 = vsel %vm551_vm14, %v2812_v60, 0.0  ;;  %v1048_v59 = vunpack.c.l.b16 %v1019_v61 }
 0x688   :  { %v1047_v0 = vunpack.c.l.b16 %v1018_v62 }
 0x689   :  { %1210 = vadd.xlane.f32.xlu2 %v1209_v54 }
 0x68a   :  { %v1049_v4 = vpack.c.b16 %v1048_v59, %v1047_v0 }
 0x68d   :  { %1232 = vrot.lane.b32.xlu0 %v3252_v11, %s3083_s14 }
 0x691   :  { %1213 = vadd.xlane.f32.xlu2 %v1212_v58 }
 0x693   :  { %v1051_v2 = vpop.permute.xlu1 %1050 }
 0x694   :  { %1063 = vmatpush.bf16.msra.mxu3 %v1051_v2 }
 0x697   :  { %2345 = vmatmul.msk.bf16.vlgmr.msra.gmra.mxu3 %vm551_vm14, %v1049_v4 }
 0x69b   :  { %v1258_v6 = vpop.permute.xlu1 %1257 }
 0x69c   :  { %1270 = vmatpush.bf16.msrb.mxu1 %v1258_v6 }
 0x6ec   :  { %v1205_v7 = vpop.xlane.xlu0 %1204 }
 0x6ed   :  { %2813 = vrcp.f32 %v1205_v7 }
 0x6f3   :  { %v2814_v15 = vpop.eup %2813 }
 0x6f4   :  { %v1208_v9 = vpop.xlane.xlu2 %1207  ;;  %v1219_v12 = vmul.f32 %v2814_v15, %v2802_v46 }
 0x6f5   :  { %2815 = vrcp.f32 %v1208_v9 }
 0x6f6   :  { %v1223_v11 = vpack.c.bf16 %v1219_v12, %v1219_v12 }
 0x6f8   :  { %v1229_v21 = vunpack.c.l.b16 %v1223_v11 }
 0x6fb   :  { %v2816_v13 = vpop.eup %2815 }
 0x6fc   :  { %v1220_v17 = vmul.f32 %v2816_v13, %v2804_v18  ;;  %v1211_v19 = vpop.xlane.xlu2 %1210  ;;  %v1113_v18 = vadd.f32 %v1103_v3, %v3331_v8 }
 0x6fd   :  { %2817 = vrcp.f32 %v1211_v19 }
 0x6fe   :  { %v1224_v1 = vpack.c.bf16 %v1220_v17, %v1220_v17 }
 0x6ff   :  { %v1233_v20 = vpop.permute.xlu0 %1232 }
 0x700   :  { %v1230_v22 = vunpack.c.l.b16 %v1224_v1  ;;  %1245 = vmatpush.bf16.msrb.mxu3 %v1233_v20 }
 0x702   :  { %v1231_v16 = vpack.c.b16 %v1230_v22, %v1229_v21  ;;  %v2484_v22 = vld [vmem:[#allocation11 + $0xe0] sm:$0xf] }
 0x703   :  { %v2818_v26 = vpop.eup %2817 }
 0x704   :  { %v1214_v25 = vpop.xlane.xlu2 %1213  ;;  %2358 = vmatmul.msk.bf16.vlgmr.msrb.gmra.mxu3 %vm551_vm14, %v1231_v16  ;;  %v1221_v27 = vmul.f32 %v2818_v26, %v2806_v50  ;;  %v700_v50 = vadd.f32 %v3345_v23, %v487_v45  ;;  %v2688_v16 = vld [vmem:[#allocation11 + $0xec] sm:$0xf0] }
 0x705   :  { %2819 = vrcp.f32 %v1214_v25  ;;  %v2686_v25 = vld [vmem:[#allocation11 + $0xe4] sm:$0xf]  ;;  %v2485_v26 = vor.u32 %v2688_v16, %v2484_v22  ;;  %v2680_v45 = vld [vmem:[#allocation11 + $0xac] sm:$0xf0] }
 0x706   :  { %v1225_v29 = vpack.c.bf16 %v1221_v27, %v1221_v27  ;;  %v907_v51 = vadd.f32 %v3355_v63, %v700_v50  ;;  %v2486_v27 = vld [vmem:[#allocation11 + $0xf0] sm:$0xf0]  ;;  %v2460_v50 = vld [vmem:[#allocation11 + $0xa8] sm:$0xf] }
 0x707   :  { %1624 = vmatpush.bf16.msra.mxu0 %v2485_v26  ;;  %v2430_v26 = vld [vmem:[#allocation11 + $0x78] sm:$0xf0] }
 0x708   :  { %v1254_v31 = vunpack.c.l.b16 %v1225_v29  ;;  %v1114_v52 = vadd.f32 %v1105_v49, %v907_v51  ;;  %v2689_v29 = vld [vmem:[#allocation11 + $0xf4] sm:$0xf0]  ;;  %v2454_v49 = vld [vmem:[#allocation11 + $0xb0] sm:$0xf0] }
 0x709   :  { %v2681_v51 = vld [vmem:[#allocation11 + $0xb4] sm:$0xf0] }
 0x70b   :  { %v2820_v28 = vpop.eup %2819 }
 0x70c   :  { %v1222_v24 = vmul.f32 %v2820_v28, %v2812_v60  ;;  %v2863_v60 = vld [vmem:[#allocation2 + $0x18] sm:$0xff]  ;;  %v2492_v28 = vld [vmem:[#allocation11 + $0xe8] sm:$0xf] }
 0x70d   :  { %v489_v8 = vadd.f32 %v2863_v60, %v3327_v39  ;;  %v2462_v60 = vld [vmem:[#allocation11 + $0xb8] sm:$0xf0] }
 0x70e   :  { %v1226_v30 = vpack.c.bf16 %v1222_v24, %v1222_v24  ;;  %v2489_v24 = vor.u32 %v2686_v25, %v2486_v27  ;;  %v2671_v25 = vld [vmem:[#allocation11 + $0x6c] sm:$0xf] }
 0x70f   :  { %v702_v23 = vadd.f32 %v3349_v56, %v489_v8  ;;  %v2433_v27 = vor.u32 %v2671_v25, %v2430_v26 }
 0x710   :  { %v1255_v32 = vunpack.c.l.b16 %v1226_v30  ;;  %v2493_v30 = vor.u32 %v2689_v29, %v2492_v28  ;;  %1643 = vmatpush.bf16.msra.mxu3 %v2489_v24  ;;  %v2404_v28 = vld [vmem:[#allocation11 + $0x40] sm:$0xf]  ;;  %v2668_v29 = vld [vmem:[#allocation11 + $0x4c] sm:$0xf0]  ;;  %v2666_v24 = vld [vmem:[#allocation11 + $0x44] sm:$0xf] }
 0x711   :  { %v909_v59 = vadd.f32 %v3361_v14, %v702_v23  ;;  %v2674_v23 = vld [vmem:[#allocation11 + $0x84] sm:$0xf] }
 0x712   :  { %v1256_v33 = vpack.c.b16 %v1255_v32, %v1254_v31  ;;  %v2687_v31 = vld [vmem:[#allocation11 + $0xec] sm:$0xf]  ;;  %v2494_v32 = vld [vmem:[#allocation11 + $0xf8] sm:$0xf0]  ;;  %1662 = vmatpush.bf16.msra.mxu1 %v2493_v30  ;;  %v2405_v30 = vor.u32 %v2668_v29, %v2404_v28 }
 0x714   :  { %2359 = vmatmul.msk.bf16.vlgmr.msrb.gmra.mxu1 %vm551_vm14, %v1256_v33  ;;  %v2497_v33 = vor.u32 %v2687_v31, %v2494_v32  ;;  %v2406_v31 = vld [vmem:[#allocation11 + $0x50] sm:$0xf0]  ;;  %v2412_v32 = vld [vmem:[#allocation11 + $0x48] sm:$0xf] }
 0x716   :  { %1681 = vmatpush.bf16.msrb.mxu2 %v2497_v33  ;;  %v2669_v33 = vld [vmem:[#allocation11 + $0x54] sm:$0xf0] }
 0x71a   :  { %v1065_v34 = vpop.f32.mrf.mxu3 }
 0x722   :  { %v1067_v53 = vpop.f32.mrf.mxu3 }
 0x723   :  { %v1071_v35 = vpack.c.bf16 %v1067_v53, %v1065_v34  ;;  %v2468_v34 = vld [vmem:[#allocation11 + $0xc0] sm:$0xf]  ;;  %v2684_v53 = vld [vmem:[#allocation11 + $0xcc] sm:$0xf0] }
 0x724   :  { %v2469_v36 = vor.u32 %v2684_v53, %v2468_v34  ;;  %v2409_v34 = vor.u32 %v2666_v24, %v2406_v31  ;;  %v2413_v53 = vor.u32 %v2669_v33, %v2412_v32 }
 0x725   :  { %2355 = vmatmul.msk.bf16.gmra.mxu0 %vm504_vm13, %v1071_v35  ;;  %v2682_v35 = vld [vmem:[#allocation11 + $0xc4] sm:$0xf] }
 0x726   :  { %1625 = vmatpush.bf16.msra.mxu0 %v2469_v36  ;;  %v2414_v36 = vld [vmem:[#allocation11 + $0x58] sm:$0xf0] }
 0x787   :  { %v1247_v38 = vpop.f32.mrf.mxu3 }
 0x78f   :  { %v1249_v40 = vpop.f32.mrf.mxu3 }
 0x790   :  { %v1277_v46 = vpack.c.bf16 %v1249_v40, %v1247_v38  ;;  %v2476_v38 = vld [vmem:[#allocation11 + $0xc8] sm:$0xf]  ;;  %v2685_v40 = vld [vmem:[#allocation11 + $0xd4] sm:$0xf0] }
 0x791   :  { %v1272_v41 = vpop.f32.mrf.mxu1 }
 0x792   :  { %2368 = vmatmul.msk.bf16.vlgmr.msra.gmra.mxu2 %vm504_vm13, %v1277_v46  ;;  %v2473_v46 = vor.u32 %v2682_v35, %v2470_v37  ;;  %v2667_v35 = vld [vmem:[#allocation11 + $0x4c] sm:$0xf] }
 0x793   :  { %v2417_v37 = vor.u32 %v2667_v35, %v2414_v36 }
 0x794   :  { %1644 = vmatpush.bf16.msra.mxu3 %v2473_v46  ;;  %v2662_v46 = vld [vmem:[#allocation11 + $0x24] sm:$0xf] }
 0x799   :  { %v1274_v42 = vpop.f32.mrf.mxu1 }
 0x79a   :  { %v1278_v43 = vpack.c.bf16 %v1274_v42, %v1272_v41  ;;  %v2477_v41 = vor.u32 %v2685_v40, %v2476_v38  ;;  %v2683_v42 = vld [vmem:[#allocation11 + $0xcc] sm:$0xf]  ;;  %v2388_v38 = vld [vmem:[#allocation11 + $0x20] sm:$0xf]  ;;  %v2664_v40 = vld [vmem:[#allocation11 + $0x2c] sm:$0xf0] }
 0x79c   :  { %1663 = vmatpush.bf16.msra.mxu1 %v2477_v41  ;;  %v2389_v41 = vor.u32 %v2664_v40, %v2388_v38  ;;  %v2745_v40 = vld [vmem:[#allocation10] ss:$0 sm:$0xff] }
 0x7a2   :  { %2369 = vmatmul.msk.bf16.gmra.mxu2 %vm504_vm13, %v1278_v43  ;;  %v1108_v57 = vpop.f32.mrf.mxu0  ;;  %v2478_v43 = vld [vmem:[#allocation11 + $0xd8] sm:$0xf0] }
 0x7a3   :  { %v1115_v61 = vadd.f32 %v1108_v57, %v3358_v5  ;;  %v2481_v3 = vor.u32 %v2683_v42, %v2478_v43  ;;  %v2679_v57 = vld [vmem:[#allocation11 + $0xac] sm:$0xf]  ;;  %v2390_v42 = vld [vmem:[#allocation11 + $0x30] sm:$0xf0]  ;;  %v2396_v43 = vld [vmem:[#allocation11 + $0x28] sm:$0xf] }
 0x7a4   :  { %v2465_v8 = vor.u32 %v2679_v57, %v2462_v60  ;;  %v2658_v57 = vld [vmem:[#allocation11 + $0x4] sm:$0xf] }
 0x7a5   :  { %1682 = vmatpush.bf16.msrb.mxu2 %v2481_v3  ;;  %v2665_v3 = vld [vmem:[#allocation11 + $0x34] sm:$0xf0] }
 0x7a9   :  { %1683 = vmatpush.bf16.msrb.mxu2 %v2465_v8 }
 0x7aa   :  { %v1110_v63 = vpop.f32.mrf.mxu0 }
 0x7ab   :  { %v1116_v0 = vadd.f32 %v1110_v63, %v909_v59  ;;  %v2438_v59 = vld [vmem:[#allocation11 + $0x90] sm:$0xf0] }
 0x815   :  { %v1310_v47 = vpop.f32.mrf.mxu2 }
 0x816   :  { %v3387_v48 = vadd.f32 %v1310_v47, %v1113_v18  ;;  %v2678_v18 = vld [vmem:[#allocation11 + $0xa4] sm:$0xf]  ;;  %v2453_v47 = vor.u32 %v2680_v45, %v2452_v44  ;;  %v2393_v45 = vor.u32 %v2662_v46, %v2390_v42 }
 0x818   :  { %1326 = vadd.xlane.f32.xlu2 %v3387_v48  ;;  %1626 = vmatpush.bf16.msra.mxu0 %v2453_v47  ;;  %v2663_v47 = vld [vmem:[#allocation11 + $0x2c] sm:$0xf] }
 0x81d   :  { %v1312_v54 = vpop.f32.mrf.mxu2 }
 0x81e   :  { %v3392_v55 = vadd.f32 %v1312_v54, %v1114_v52  ;;  %v2457_v52 = vor.u32 %v2678_v18, %v2454_v49  ;;  %v2461_v54 = vor.u32 %v2681_v51, %v2460_v50  ;;  %v2397_v18 = vor.u32 %v2665_v3, %v2396_v43  ;;  %v2398_v49 = vld [vmem:[#allocation11 + $0x38] sm:$0xf0] }
 0x81f   :  { %v2401_v51 = vor.u32 %v2663_v47, %v2398_v49 }
 0x820   :  { %1328 = vadd.xlane.f32.xlu0 %v3392_v55  ;;  %1645 = vmatpush.bf16.msra.mxu3 %v2457_v52  ;;  %v2372_v52 = vld [vmem:[#allocation11] sm:$0xf] }
 0x821   :  { %1664 = vmatpush.bf16.msra.mxu1 %v2461_v54  ;;  %v2660_v54 = vld [vmem:[#allocation11 + $0xc] sm:$0xf0] }
 0x822   :  { %v2373_v8 = vor.u32 %v2660_v54, %v2372_v52 }
 0x825   :  { %v1315_v62 = vpop.f32.mrf.mxu2 }
 0x826   :  { %v3397_v58 = vadd.f32 %v1315_v62, %v1115_v61  ;;  %v2436_v61 = vld [vmem:[#allocation11 + $0x80] sm:$0xf]  ;;  %v2676_v62 = vld [vmem:[#allocation11 + $0x8c] sm:$0xf0] }
 0x827   :  { %v2437_v63 = vor.u32 %v2676_v62, %v2436_v61  ;;  %v2374_v61 = vld [vmem:[#allocation11 + $0x10] sm:$0xf0]  ;;  %v2380_v62 = vld [vmem:[#allocation11 + $0x8] sm:$0xf] }
 0x828   :  { %1330 = vadd.xlane.f32.xlu1 %v3397_v58 }
 0x829   :  { %1627 = vmatpush.bf16.msra.mxu0 %v2437_v63  ;;  %v2661_v63 = vld [vmem:[#allocation11 + $0x14] sm:$0xf0] }
 0x82d   :  { %v1317_v2 = vpop.f32.mrf.mxu2 }
 0x82e   :  { %v3402_v4 = vadd.f32 %v1317_v2, %v1116_v0  ;;  %v2444_v0 = vld [vmem:[#allocation11 + $0x88] sm:$0xf]  ;;  %v2677_v2 = vld [vmem:[#allocation11 + $0x94] sm:$0xf0] }
 0x830   :  { %1332 = vadd.xlane.f32.xlu2 %v3402_v4 }
 0x88b   :  { %v1327_v6 = vpop.xlane.xlu2 %1326 }
 0x88c   :  { %v1334_v39 = vmul.f32 %v1327_v6, %v3183_v10  ;;  %v2441_v6 = vor.u32 %v2674_v23, %v2438_v59  ;;  %v2377_v23 = vor.u32 %v2658_v57, %v2374_v61  ;;  %v2659_v59 = vld [vmem:[#allocation11 + $0xc] sm:$0xf] }
 0x88e   :  { %v3407_v5 = vsub.f32 %v3387_v48, %v1334_v39  ;;  %v2445_v39 = vor.u32 %v2677_v2, %v2444_v0  ;;  %1646 = vmatpush.bf16.msra.mxu3 %v2441_v6  ;;  %v2382_v0 = vld [vmem:[#allocation11 + $0x18] sm:$0xf0]  ;;  %v2381_v2 = vor.u32 %v2661_v63, %v2380_v62 }
 0x88f   :  { %v2385_v6 = vor.u32 %v2659_v59, %v2382_v0  ;;  %v2697_v63 = vld [vmem:[#allocation13 + $0x38] sm:$0xff]  ;;  %v2712_v0 = vld [vmem:[#allocation13 + $0xb0] sm:$0xff] }
 0x890   :  { %v1342_v56 = vmul.f32 %v3407_v5, %v3407_v5  ;;  %1665 = vmatpush.bf16.msra.mxu1 %v2445_v39  ;;  %v2713_v59 = vld [vmem:[#allocation13 + $0xb8] sm:$0xff] }
 0x892   :  { %1346 = vadd.xlane.f32.xlu2 %v1342_v56  ;;  %v2675_v56 = vld [vmem:[#allocation11 + $0x8c] sm:$0xf] }
 0x893   :  { %v1329_v7 = vpop.xlane.xlu0 %1328 }
 0x894   :  { %v1335_v9 = vmul.f32 %v1329_v7, %v3183_v10  ;;  %v2446_v7 = vld [vmem:[#allocation11 + $0x98] sm:$0xf0] }
 0x896   :  { %v3413_v14 = vsub.f32 %v3392_v55, %v1335_v9  ;;  %v2449_v9 = vor.u32 %v2675_v56, %v2446_v7 }
 0x898   :  { %v1343_v15 = vmul.f32 %v3413_v14, %v3413_v14  ;;  %1684 = vmatpush.bf16.msrb.mxu2 %v2449_v9 }
 0x89a   :  { %1348 = vadd.xlane.f32.xlu2 %v1343_v15  ;;  %v2420_v15 = vld [vmem:[#allocation11 + $0x60] sm:$0xf] }
 0x89b   :  { %v1331_v12 = vpop.xlane.xlu1 %1330 }
 0x89c   :  { %v1336_v13 = vmul.f32 %v1331_v12, %v3183_v10  ;;  %v2672_v12 = vld [vmem:[#allocation11 + $0x6c] sm:$0xf0]  ;;  %1685 = vmatpush.bf16.msrb.mxu2 %v2433_v27 }
 0x89e   :  { %v3419_v11 = vsub.f32 %v3397_v58, %v1336_v13  ;;  %v2670_v13 = vld [vmem:[#allocation11 + $0x64] sm:$0xf] }
 0x8a0   :  { %v1344_v17 = vmul.f32 %v3419_v11, %v3419_v11  ;;  %1686 = vmatpush.bf16.msrb.mxu2 %v2417_v37 }
 0x8a2   :  { %1350 = vadd.xlane.f32.xlu2 %v1344_v17  ;;  %v2421_v17 = vor.u32 %v2672_v12, %v2420_v15 }
 0x8a3   :  { %v1333_v19 = vpop.xlane.xlu2 %1332 }
 0x8a4   :  { %v1337_v1 = vmul.f32 %v1333_v19, %v3183_v10  ;;  %v2422_v19 = vld [vmem:[#allocation11 + $0x70] sm:$0xf0]  ;;  %1628 = vmatpush.bf16.msra.mxu0 %v2421_v17  ;;  %1687 = vmatpush.bf16.msrb.mxu2 %v2401_v51 }
 0x8a5   :  { %v2425_v22 = vor.u32 %v2670_v13, %v2422_v19 }
 0x8a6   :  { %v3425_v20 = vsub.f32 %v3402_v4, %v1337_v1  ;;  %v2428_v1 = vld [vmem:[#allocation11 + $0x68] sm:$0xf] }
 0x8a7   :  { %1647 = vmatpush.bf16.msra.mxu3 %v2425_v22 }
 0x8a8   :  { %v1345_v21 = vmul.f32 %v3425_v20, %v3425_v20  ;;  %1629 = vmatpush.bf16.msra.mxu0 %v2405_v30  ;;  %1688 = vmatpush.bf16.msrb.mxu2 %v2385_v6  ;;  %v2721_v6 = vld [vmem:[#allocation13 + $0xf8] sm:$0xff] }
 0x8aa   :  { %1352 = vadd.xlane.f32.xlu2 %v1345_v21  ;;  %v2673_v21 = vld [vmem:[#allocation11 + $0x74] sm:$0xf0] }
 0x8ab   :  { %v2429_v16 = vor.u32 %v2673_v21, %v2428_v1  ;;  %1648 = vmatpush.bf16.msra.mxu3 %v2409_v34  ;;  %v2744_v34 = vld [vmem:[%s3548_s6] ss:$0 sm:$0xff] }
 0x8ac   :  { %1630 = vmatpush.bf16.msra.mxu0 %v2389_v41  ;;  %2169 = vmatpush.bf16.msra.mxu2 %v2721_v6 }
 0x8ad   :  { %1666 = vmatpush.bf16.msra.mxu1 %v2429_v16 }
 0x8af   :  { %1649 = vmatpush.bf16.msra.mxu3 %v2393_v45 }
 0x8b0   :  { %1631 = vmatpush.bf16.msra.mxu0 %v2373_v8 }
 0x8b1   :  { %1667 = vmatpush.bf16.msra.mxu1 %v2413_v53 }
 0x8b3   :  { %1650 = vmatpush.bf16.msra.mxu3 %v2377_v23 }
 0x8b4   :  { %2112 = vmatpush.bf16.msrb.mxu0 %v2697_v63 }
 0x8b5   :  { %1668 = vmatpush.bf16.msra.mxu1 %v2397_v18 }
 0x8b9   :  { %1669 = vmatpush.bf16.msra.mxu1 %v2381_v2  ;;  %v2705_v2 = vld [vmem:[#allocation13 + $0x78] sm:$0xff] }
 0x8ba   :  { %2131 = vmatpush.bf16.msrb.mxu3 %v2705_v2 }
 0x8bd   :  { %2150 = vmatpush.bf16.msrb.mxu1 %v2713_v59 }
 0x8c1   :  { %2151 = vmatpush.bf16.msrb.mxu1 %v2712_v0 }
 0x905   :  { %v1347_v44 = vpop.xlane.xlu2 %1346 }
 0x906   :  { %v1354_v50 = vmul.f32 %v1347_v44, %v3183_v10 }
 0x908   :  { %v1358_v60 = vadd.f32 1e-05, %v1354_v50 }
 0x90a   :  { %2821 = vrsqrt.f32 %v1358_v60  ;;  %vm1368_vm0 = vweird.f32 %v1358_v60 }
 0x90d   :  { %v1349_v39 = vpop.xlane.xlu2 %1348 }
 0x90e   :  { %v1355_v56 = vmul.f32 %v1349_v39, %v3183_v10  ;;  %v2711_v39 = vld [vmem:[#allocation13 + $0xa8] sm:$0xff] }
 0x90f   :  { %2152 = vmatpush.bf16.msrb.mxu1 %v2711_v39 }
 0x910   :  { %v2822_v7 = vpop.eup %2821  ;;  %v1359_v9 = vadd.f32 1e-05, %v1355_v56  ;;  %v2704_v56 = vld [vmem:[#allocation13 + $0x70] sm:$0xff] }
 0x911   :  { %v1363_v15 = vmul.f32 %v2822_v7, %v1358_v60  ;;  %vm1369_vm15 = vweird.f32 %v2822_v7  ;;  %2132 = vmatpush.bf16.msrb.mxu3 %v2704_v56 }
 0x912   :  { %2823 = vrsqrt.f32 %v1359_v9  ;;  %vm1370_vm1 = vmor %vm1368_vm0, %vm1369_vm15  ;;  %vm1378_vm3 = vweird.f32 %v1359_v9 }
 0x913   :  { %v1364_v12 = vmul.f32 %v2822_v7, %v1363_v15  ;;  %v2710_v15 = vld [vmem:[#allocation13 + $0xa0] sm:$0xff] }
 0x914   :  { %2153 = vmatpush.bf16.msrb.mxu1 %v2710_v15 }
 0x915   :  { %v1365_v13 = vmul.f32 0.5, %v1364_v12  ;;  %v1351_v17 = vpop.xlane.xlu2 %1350  ;;  %v2703_v12 = vld [vmem:[#allocation13 + $0x68] sm:$0xff] }
 0x916   :  { %v1356_v19 = vmul.f32 %v1351_v17, %v3183_v10  ;;  %2133 = vmatpush.bf16.msrb.mxu3 %v2703_v12  ;;  %v2693_v17 = vld [vmem:[#allocation13 + $0x18] sm:$0xff] }
 0x917   :  { %v1366_v1 = vsub.f32 1.5, %v1365_v13  ;;  %v2719_v13 = vld [vmem:[#allocation13 + $0xe8] sm:$0xff] }
 0x918   :  { %v2824_v21 = vpop.eup %2823  ;;  %v1360_v22 = vadd.f32 1e-05, %v1356_v19  ;;  %v2709_v19 = vld [vmem:[#allocation13 + $0x98] sm:$0xff] }
 0x919   :  { %v1367_v16 = vmul.f32 %v2822_v7, %v1366_v1  ;;  %v1373_v25 = vmul.f32 %v2824_v21, %v1359_v9  ;;  %vm1379_vm2 = vweird.f32 %v2824_v21  ;;  %v2694_v9 = vld [vmem:[#allocation13 + $0x20] sm:$0xff]  ;;  %2154 = vmatpush.bf16.msrb.mxu1 %v2709_v19 }
 0x91a   :  { %2825 = vrsqrt.f32 %v1360_v22  ;;  %vm1380_vm4 = vmor %vm1378_vm3, %vm1379_vm2  ;;  %vm1388_vm6 = vweird.f32 %v1360_v22  ;;  %v2702_v1 = vld [vmem:[#allocation13 + $0x60] sm:$0xff] }
 0x91b   :  { %v1374_v26 = vmul.f32 %v2824_v21, %v1373_v25  ;;  %v1371_v27 = vsel %vm1370_vm1, %v2822_v7, %v1367_v16  ;;  %v2720_v7 = vld [vmem:[#allocation13 + $0xf0] sm:$0xff]  ;;  %2134 = vmatpush.bf16.msrb.mxu3 %v2702_v1  ;;  %v2701_v25 = vld [vmem:[#allocation13 + $0x58] sm:$0xff] }
 0x91c   :  { %v1402_v32 = vmul.f32 %v1371_v27, %v3407_v5  ;;  %2170 = vmatpush.bf16.msra.mxu2 %v2720_v7  ;;  %v2708_v16 = vld [vmem:[#allocation13 + $0x90] sm:$0xff]  ;;  %v1454_v27 = vld [vmem:[%s3551_s9] sm:$0xf] }
 0x91d   :  { %v1375_v28 = vmul.f32 0.5, %v1374_v26  ;;  %v1353_v29 = vpop.xlane.xlu2 %1352  ;;  %2155 = vmatpush.bf16.msrb.mxu1 %v2708_v16  ;;  %v2717_v26 = vld [vmem:[#allocation13 + $0xd8] sm:$0xff] }
 0x91e   :  { %v1357_v24 = vmul.f32 %v1353_v29, %v3183_v10  ;;  %v1409_v10 = vmul.f32 %v2744_v34, %v1402_v32  ;;  %v2707_v29 = vld [vmem:[#allocation13 + $0x88] sm:$0xff]  ;;  %v3445_v32 = vperm.slane %v1454_v27, 2 }
 0x91f   :  { %v1376_v30 = vsub.f32 1.5, %v1375_v28  ;;  %2135 = vmatpush.bf16.msrb.mxu3 %v2701_v25  ;;  %v2691_v28 = vld [vmem:[#allocation13 + $0x8] sm:$0xff] }
 0x920   :  { %v2826_v31 = vpop.eup %2825  ;;  %v1361_v33 = vadd.f32 1e-05, %v1357_v24  ;;  %v1416_v43 = vadd.f32 %v2745_v40, %v1409_v10  ;;  %2171 = vmatpush.bf16.msra.mxu2 %v2719_v13  ;;  %v2700_v24 = vld [vmem:[#allocation13 + $0x50] sm:$0xff] }
 0x921   :  { %v1377_v53 = vmul.f32 %v2824_v21, %v1376_v30  ;;  %v1383_v35 = vmul.f32 %v2826_v31, %v1360_v22  ;;  %vm1389_vm5 = vweird.f32 %v2826_v31  ;;  %v2692_v22 = vld [vmem:[#allocation13 + $0x10] sm:$0xff]  ;;  %2156 = vmatpush.bf16.msrb.mxu1 %v2707_v29 }
 0x922   :  { %2827 = vrsqrt.f32 %v1361_v33  ;;  %vm1390_vm7 = vmor %vm1388_vm6, %vm1389_vm5  ;;  %vm1398_vm9 = vweird.f32 %v1361_v33  ;;  %v2716_v30 = vld [vmem:[#allocation13 + $0xd0] sm:$0xff] }
 0x923   :  { %v1381_v36 = vsel %vm1380_vm4, %v2824_v21, %v1377_v53  ;;  %v1384_v37 = vmul.f32 %v2826_v31, %v1383_v35  ;;  %v2718_v21 = vld [vmem:[#allocation13 + $0xe0] sm:$0xff]  ;;  %2136 = vmatpush.bf16.msrb.mxu3 %v2700_v24  ;;  %v2699_v35 = vld [vmem:[#allocation13 + $0x48] sm:$0xff] }
 0x924   :  { %v1403_v38 = vmul.f32 %v1381_v36, %v3413_v14  ;;  %2172 = vmatpush.bf16.msra.mxu2 %v2718_v21  ;;  %v2715_v36 = vld [vmem:[#allocation13 + $0xc8] sm:$0xff] }
 0x925   :  { %v1385_v46 = vmul.f32 0.5, %v1384_v37 }
 0x926   :  { %v1410_v41 = vmul.f32 %v2744_v34, %v1403_v38 }
 0x927   :  { %v1386_v42 = vsub.f32 1.5, %v1385_v46  ;;  %2137 = vmatpush.bf16.msrb.mxu3 %v2699_v35  ;;  %v3449_v46 = vperm.slane %v1454_v27, 1 }
 0x928   :  { %v2828_v5 = vpop.eup %2827  ;;  %v1417_v3 = vadd.f32 %v2745_v40, %v1410_v41  ;;  %2173 = vmatpush.bf16.msra.mxu2 %v2717_v26  ;;  %v2698_v41 = vld [vmem:[#allocation13 + $0x40] sm:$0xff] }
 0x929   :  { %v1387_v44 = vmul.f32 %v2826_v31, %v1386_v42  ;;  %v1393_v45 = vmul.f32 %v2828_v5, %v1361_v33  ;;  %vm1399_vm8 = vweird.f32 %v2828_v5  ;;  %v2690_v33 = vld [vmem:[#allocation13] sm:$0xff] }
 0x92a   :  { %v1420_v18 = vpack.c.bf16 %v1417_v3, %v1416_v43  ;;  %vm1400_vm10 = vmor %vm1398_vm9, %vm1399_vm8  ;;  %v2714_v42 = vld [vmem:[#allocation13 + $0xc0] sm:$0xff]  ;;  %v3451_v43 = vperm.slane %v1454_v27, 3 }
 0x92b   :  { %v1394_v47 = vmul.f32 %v2828_v5, %v1393_v45  ;;  %v1391_v49 = vsel %vm1390_vm7, %v2826_v31, %v1387_v44  ;;  %v3443_v31 = vperm.slane %v1454_v27, 0  ;;  %2138 = vmatpush.bf16.msrb.mxu3 %v2698_v41 }
 0x92c   :  { %1632 = vmatmul.bf16.vlgmr.msra.gmra.mxu0 %v1420_v18  ;;  %1651 = vmatmul.bf16.vlgmr.msra.gmra.mxu3 %v1420_v18  ;;  %v1404_v51 = vmul.f32 %v1391_v49, %v3419_v11  ;;  %v2696_v11 = vld [vmem:[#allocation13 + $0x30] sm:$0xff] }
 0x92d   :  { %v1395_v50 = vmul.f32 0.5, %v1394_v47  ;;  %1670 = vmatmul.bf16.vlgmr.msra.gmra.mxu1 %v1420_v18  ;;  %1689 = vmatmul.bf16.vlgmr.msrb.gmra.mxu2 %v1420_v18 }
 0x92e   :  { %v1411_v60 = vmul.f32 %v2744_v34, %v1404_v51  ;;  %2113 = vmatpush.bf16.msrb.mxu0 %v2696_v11  ;;  %2174 = vmatpush.bf16.msra.mxu2 %v2716_v30 }
 0x92f   :  { %v1396_v14 = vsub.f32 1.5, %v1395_v50 }
 0x930   :  { %v1418_v61 = vadd.f32 %v2745_v40, %v1411_v60 }
 0x931   :  { %v1397_v52 = vmul.f32 %v2828_v5, %v1396_v14 }
 0x932   :  { %2175 = vmatpush.bf16.msra.mxu2 %v2715_v36 }
 0x933   :  { %v1401_v54 = vsel %vm1400_vm10, %v2828_v5, %v1397_v52 }
 0x934   :  { %v1405_v57 = vmul.f32 %v1401_v54, %v3425_v20  ;;  %v2695_v20 = vld [vmem:[#allocation13 + $0x28] sm:$0xff] }
 0x935   :  { %2114 = vmatpush.bf16.msrb.mxu0 %v2695_v20 }
 0x936   :  { %v1412_v8 = vmul.f32 %v2744_v34, %v1405_v57  ;;  %v2706_v34 = vld [vmem:[#allocation13 + $0x80] sm:$0xff]  ;;  %2176 = vmatpush.bf16.msra.mxu2 %v2714_v42 }
 0x937   :  { %2157 = vmatpush.bf16.msrb.mxu1 %v2706_v34 }
 0x938   :  { %v1419_v62 = vadd.f32 %v2745_v40, %v1412_v8 }
 0x939   :  { %2115 = vmatpush.bf16.msrb.mxu0 %v2694_v9 }
 0x93a   :  { %v1421_v23 = vpack.c.bf16 %v1419_v62, %v1418_v61 }
 0x93c   :  { %1637 = vmatmul.bf16.gmra.mxu0 %v1421_v23  ;;  %1656 = vmatmul.bf16.gmra.mxu3 %v1421_v23 }
 0x93d   :  { %1675 = vmatmul.bf16.gmra.mxu1 %v1421_v23  ;;  %1694 = vmatmul.bf16.gmra.mxu2 %v1421_v23 }
 0x93e   :  { %2116 = vmatpush.bf16.msrb.mxu0 %v2693_v17 }
 0x942   :  { %2117 = vmatpush.bf16.msrb.mxu0 %v2692_v22 }
 0x946   :  { %2118 = vmatpush.bf16.msrb.mxu0 %v2691_v28 }
 0x94a   :  { %2119 = vmatpush.bf16.msrb.mxu0 %v2690_v33 }
 0x9a9   :  { %v1633_v53 = vpop.f32.mrf.mxu0 }
 0x9aa   :  { %v1634_v37 = vadd.f32 %v1633_v53, %v3443_v31  ;;  %v1671_v38 = vpop.f32.mrf.mxu1 }
 0x9ab   :  { %v1672_v10 = vadd.f32 %v1671_v38, %v3445_v32 }
 0x9ac   :  { %v1716_v40 = vmul.f32 0.044715, %v1634_v37  ;;  %v1700_v29 = vmul.f32 0.5, %v1634_v37 }
 0x9ad   :  { %v1718_v5 = vmul.f32 0.044715, %v1672_v10  ;;  %v1702_v24 = vmul.f32 0.5, %v1672_v10 }
 0x9ae   :  { %v1732_v3 = vmul.f32 %v1716_v40, %v1634_v37 }
 0x9af   :  { %v1734_v44 = vmul.f32 %v1718_v5, %v1672_v10  ;;  %v1652_v45 = vpop.f32.mrf.mxu3 }
 0x9b0   :  { %v1748_v18 = vmul.f32 %v1732_v3, %v1634_v37  ;;  %v1653_v47 = vadd.f32 %v1652_v45, %v3449_v46  ;;  %v1690_v49 = vpop.f32.mrf.mxu2 }
 0x9b1   :  { %v1750_v50 = vmul.f32 %v1734_v44, %v1672_v10  ;;  %v1691_v14 = vadd.f32 %v1690_v49, %v3451_v43  ;;  %v1635_v51 = vpop.f32.mrf.mxu0 }
 0x9b2   :  { %v1764_v52 = vadd.f32 %v1748_v18, %v1634_v37  ;;  %v1717_v54 = vmul.f32 0.044715, %v1653_v47  ;;  %v1636_v57 = vadd.f32 %v1635_v51, %v3443_v31  ;;  %v1673_v60 = vpop.f32.mrf.mxu1  ;;  %v3466_v5 = vmul.f32 0.5, %v1653_v47 }
 0x9b3   :  { %v1766_v8 = vadd.f32 %v1750_v50, %v1672_v10  ;;  %v1719_v61 = vmul.f32 0.044715, %v1691_v14  ;;  %v1674_v62 = vadd.f32 %v1673_v60, %v3445_v32  ;;  %v3468_v3 = vmul.f32 0.5, %v1691_v14 }
 0x9b4   :  { %v1780_v23 = vmul.f32 0.7978846, %v1764_v52  ;;  %v1733_v63 = vmul.f32 %v1717_v54, %v1653_v47  ;;  %v1720_v59 = vmul.f32 0.044715, %v1636_v57  ;;  %v1704_v45 = vmul.f32 0.5, %v1636_v57 }
 0x9b5   :  { %v1782_v11 = vmul.f32 0.7978846, %v1766_v8  ;;  %v1735_v0 = vmul.f32 %v1719_v61, %v1691_v14  ;;  %v1722_v2 = vmul.f32 0.044715, %v1674_v62  ;;  %v1706_v52 = vmul.f32 0.5, %v1674_v62 }
 0x9b6   :  { %v1749_v6 = vmul.f32 %v1733_v63, %v1653_v47  ;;  %v1736_v20 = vmul.f32 %v1720_v59, %v1636_v57  ;;  %2829 = vtanh.f32 %v1780_v23 }
 0x9b7   :  { %v1751_v39 = vmul.f32 %v1735_v0, %v1691_v14  ;;  %v1738_v56 = vmul.f32 %v1722_v2, %v1674_v62  ;;  %v1654_v7 = vpop.f32.mrf.mxu3  ;;  %2831 = vtanh.f32 %v1782_v11 }
 0x9b8   :  { %v1765_v9 = vadd.f32 %v1749_v6, %v1653_v47  ;;  %v1752_v15 = vmul.f32 %v1736_v20, %v1636_v57  ;;  %v1655_v12 = vadd.f32 %v1654_v7, %v3449_v46  ;;  %v1692_v13 = vpop.f32.mrf.mxu2 }
 0x9b9   :  { %v1767_v17 = vadd.f32 %v1751_v39, %v1691_v14  ;;  %v1754_v19 = vmul.f32 %v1738_v56, %v1674_v62  ;;  %v1693_v1 = vadd.f32 %v1692_v13, %v3451_v43  ;;  %v1638_v21 = vpop.f32.mrf.mxu0 }
 0x9ba   :  { %v1768_v22 = vadd.f32 %v1752_v15, %v1636_v57  ;;  %v1721_v16 = vmul.f32 0.044715, %v1655_v12  ;;  %v3460_v25 = vadd.f32 %v1638_v21, %v3443_v31  ;;  %v1676_v26 = vpop.f32.mrf.mxu1  ;;  %v1781_v33 = vmul.f32 0.7978846, %v1765_v9 }
 0x9bb   :  { %v1770_v27 = vadd.f32 %v1754_v19, %v1674_v62  ;;  %v1723_v28 = vmul.f32 0.044715, %v1693_v1  ;;  %v3463_v35 = vadd.f32 %v1676_v26, %v3445_v32  ;;  %v1783_v36 = vmul.f32 0.7978846, %v1767_v17 }
 0x9bc   :  { %v2830_v30 = vpop.eup %2829  ;;  %v1784_v34 = vmul.f32 0.7978846, %v1768_v22  ;;  %v1737_v53 = vmul.f32 %v1721_v16, %v1655_v12  ;;  %v1724_v41 = vmul.f32 0.044715, %v3460_v25  ;;  %v1705_v8 = vmul.f32 0.5, %v1655_v12 }
 0x9bd   :  { %v1786_v38 = vmul.f32 0.7978846, %v1770_v27  ;;  %v1739_v40 = vmul.f32 %v1723_v28, %v1693_v1  ;;  %v2832_v37 = vpop.eup %2831  ;;  %v1812_v18 = vadd.f32 1.0, %v2830_v30  ;;  %v1726_v50 = vmul.f32 0.044715, %v3463_v35 }
 0x9be   :  { %v1753_v42 = vmul.f32 %v1737_v53, %v1655_v12  ;;  %2833 = vtanh.f32 %v1784_v34  ;;  %v1740_v47 = vmul.f32 %v1724_v41, %v3460_v25  ;;  %v1814_v57 = vadd.f32 1.0, %v2832_v37 }
 0x9bf   :  { %v1755_v10 = vmul.f32 %v1739_v40, %v1693_v1  ;;  %v1657_v44 = vpop.f32.mrf.mxu3  ;;  %2835 = vtanh.f32 %v1786_v38  ;;  %v1707_v63 = vmul.f32 0.5, %v1693_v1  ;;  %v1828_v0 = vmul.f32 %v1812_v18, %v1700_v29 }
 0x9c0   :  { %v1769_v49 = vadd.f32 %v1753_v42, %v1655_v12  ;;  %v1695_v51 = vpop.f32.mrf.mxu2  ;;  %2837 = vtanh.f32 %v1781_v33  ;;  %v1756_v62 = vmul.f32 %v1740_v47, %v3460_v25  ;;  %v3480_v6 = vadd.f32 %v1657_v44, %v3449_v46 }
 0x9c1   :  { %v1771_v54 = vadd.f32 %v1755_v10, %v1693_v1  ;;  %v1640_v60 = vpop.f32.mrf.mxu0  ;;  %2839 = vtanh.f32 %v1783_v36  ;;  %v3487_v15 = vadd.f32 %v1695_v51, %v3451_v43  ;;  %v1830_v13 = vmul.f32 %v1814_v57, %v1702_v24 }
 0x9c2   :  { %v1785_v14 = vmul.f32 0.7978846, %v1769_v49  ;;  %v3473_v61 = vadd.f32 %v1640_v60, %v3443_v31  ;;  %v1678_v23 = vpop.f32.mrf.mxu1  ;;  %v1742_v31 = vmul.f32 %v1726_v50, %v3463_v35  ;;  %v1725_v24 = vmul.f32 0.044715, %v3480_v6 }
 0x9c3   :  { %v1787_v59 = vmul.f32 0.7978846, %v1771_v54  ;;  %v3476_v11 = vadd.f32 %v1678_v23, %v3445_v32  ;;  %v1772_v32 = vadd.f32 %v1756_v62, %v3460_v25  ;;  %v1727_v37 = vmul.f32 0.044715, %v3487_v15 }
 0x9c4   :  { %v2834_v2 = vpop.eup %2833  ;;  %v1728_v20 = vmul.f32 0.044715, %v3473_v61  ;;  %2841 = vtanh.f32 %v1785_v14  ;;  %v1758_v26 = vmul.f32 %v1742_v31, %v3463_v35  ;;  %v1741_v60 = vmul.f32 %v1725_v24, %v3480_v6 }
 0x9c5   :  { %v2836_v39 = vpop.eup %2835  ;;  %v1730_v56 = vmul.f32 0.044715, %v3476_v11  ;;  %v1816_v7 = vadd.f32 1.0, %v2834_v2  ;;  %2843 = vtanh.f32 %v1787_v59  ;;  %v1788_v22 = vmul.f32 0.7978846, %v1772_v32 }
 0x9c6   :  { %v2838_v9 = vpop.eup %2837  ;;  %v1818_v12 = vadd.f32 1.0, %v2836_v39  ;;  %v1744_v17 = vmul.f32 %v1728_v20, %v3473_v61  ;;  %v1743_v20 = vmul.f32 %v1727_v37, %v3487_v15 }
 0x9c7   :  { %v2840_v19 = vpop.eup %2839  ;;  %v1659_v1 = vpop.f32.mrf.mxu3  ;;  %v1832_v21 = vmul.f32 %v1816_v7, %v1704_v45  ;;  %v1746_v16 = vmul.f32 %v1730_v56, %v3476_v11  ;;  %v1813_v30 = vadd.f32 1.0, %v2838_v9  ;;  %2845 = vtanh.f32 %v1788_v22 }
 0x9c8   :  { %v3493_v27 = vadd.f32 %v1659_v1, %v3449_v46  ;;  %v1697_v28 = vpop.f32.mrf.mxu2  ;;  %v1834_v29 = vmul.f32 %v1818_v12, %v1706_v52  ;;  %v1760_v33 = vmul.f32 %v1744_v17, %v3473_v61  ;;  %v1815_v36 = vadd.f32 1.0, %v2840_v19 }
 0x9c9   :  { %v3498_v34 = vadd.f32 %v1697_v28, %v3451_v43  ;;  %v1844_v53 = vpack.c.bf16 %v1832_v21, %v1828_v0  ;;  %v1762_v44 = vmul.f32 %v1746_v16, %v3476_v11  ;;  %v1774_v45 = vadd.f32 %v1758_v26, %v3463_v35 }
 0x9ca   :  { %v2842_v38 = vpop.eup %2841  ;;  %v1729_v40 = vmul.f32 0.044715, %v3493_v27  ;;  %v1846_v41 = vpack.c.bf16 %v1834_v29, %v1830_v13  ;;  %v1776_v42 = vadd.f32 %v1760_v33, %v3473_v61  ;;  %v1829_v18 = vmul.f32 %v1813_v30, %v3466_v5 }
 0x9cb   :  { %v2844_v46 = vpop.eup %2843  ;;  %2120 = vmatmul.bf16.vlgmr.msrb.gmra.mxu0 %v1844_v53  ;;  %v1817_v10 = vadd.f32 1.0, %v2842_v38  ;;  %v1731_v43 = vmul.f32 0.044715, %v3498_v34  ;;  %v1778_v52 = vadd.f32 %v1762_v44, %v3476_v11  ;;  %v1790_v54 = vmul.f32 0.7978846, %v1774_v45 }
 0x9cc   :  { %2158 = vmatmul.bf16.vlgmr.msrb.gmra.mxu1 %v1846_v41  ;;  %v1819_v49 = vadd.f32 1.0, %v2844_v46  ;;  %v1792_v50 = vmul.f32 0.7978846, %v1776_v42  ;;  %v1831_v47 = vmul.f32 %v1815_v36, %v3468_v3  ;;  %v1745_v23 = vmul.f32 %v1729_v40, %v3493_v27 }
 0x9cd   :  { %v1833_v51 = vmul.f32 %v1817_v10, %v1705_v8  ;;  %v1794_v59 = vmul.f32 0.7978846, %v1778_v52  ;;  %v1757_v0 = vmul.f32 %v1741_v60, %v3480_v6  ;;  %v2846_v5 = vpop.eup %2845  ;;  %v1747_v3 = vmul.f32 %v1731_v43, %v3498_v34 }
 0x9ce   :  { %v1835_v14 = vmul.f32 %v1819_v49, %v1707_v63  ;;  %2847 = vtanh.f32 %v1792_v50  ;;  %v1761_v8 = vmul.f32 %v1745_v23, %v3493_v27  ;;  %v1820_v31 = vadd.f32 1.0, %v2846_v5 }
 0x9cf   :  { %v1845_v57 = vpack.c.bf16 %v1833_v51, %v1829_v18  ;;  %2849 = vtanh.f32 %v1790_v54  ;;  %v1773_v2 = vadd.f32 %v1757_v0, %v3480_v6  ;;  %v1759_v56 = vmul.f32 %v1743_v20, %v3487_v15 }
 0x9d0   :  { %v1847_v62 = vpack.c.bf16 %v1835_v14, %v1831_v47  ;;  %2851 = vtanh.f32 %v1794_v59  ;;  %v1777_v63 = vadd.f32 %v1761_v8, %v3493_v27  ;;  %v1763_v7 = vmul.f32 %v1747_v3, %v3498_v34 }
 0x9d1   :  { %2139 = vmatmul.bf16.vlgmr.msrb.gmra.mxu3 %v1845_v57  ;;  %v1789_v39 = vmul.f32 0.7978846, %v1773_v2  ;;  %v1708_v9 = vmul.f32 0.5, %v3460_v25  ;;  %v1712_v12 = vmul.f32 0.5, %v3473_v61  ;;  %v1775_v1 = vadd.f32 %v1759_v56, %v3487_v15 }
 0x9d2   :  { %2177 = vmatmul.bf16.vlgmr.msra.gmra.mxu2 %v1847_v62  ;;  %v1793_v13 = vmul.f32 0.7978846, %v1777_v63  ;;  %v1779_v21 = vadd.f32 %v1763_v7, %v3498_v34  ;;  %v1710_v33 = vmul.f32 0.5, %v3463_v35  ;;  %v1714_v25 = vmul.f32 0.5, %v3476_v11 }
 0x9d3   :  { %2853 = vtanh.f32 %v1789_v39  ;;  %v1836_v26 = vmul.f32 %v1820_v31, %v1708_v9  ;;  %v1791_v29 = vmul.f32 0.7978846, %v1775_v1  ;;  %v1709_v46 = vmul.f32 0.5, %v3480_v6 }
 0x9d4   :  { %v2848_v32 = vpop.eup %2847  ;;  %2855 = vtanh.f32 %v1793_v13  ;;  %v1795_v30 = vmul.f32 0.7978846, %v1779_v21  ;;  %v1713_v37 = vmul.f32 0.5, %v3493_v27  ;;  %v1711_v49 = vmul.f32 0.5, %v3487_v15  ;;  %v2746_v27 = vld [vmem:[%s3553_s11] ss:$0 sm:$0xff] }
 0x9d5   :  { %v2850_v17 = vpop.eup %2849  ;;  %v1824_v19 = vadd.f32 1.0, %v2848_v32  ;;  %2857 = vtanh.f32 %v1791_v29  ;;  %v1715_v50 = vmul.f32 0.5, %v3498_v34  ;;  %s3084_s11 = smov [#allocation14]  }
 0x9d6   :  { %v1822_v22 = vadd.f32 1.0, %v2850_v17  ;;  %v2852_v16 = vpop.eup %2851  ;;  %2859 = vtanh.f32 %v1795_v30  ;;  %s2200_s28 = sshll.u32 %s3084_s11, 4  ;;  %s2201_s28 = int_to_ptr.vmem [resolvable:$true] %s2200_s28 }
 0x9d7   :  { %v1840_v28 = vmul.f32 %v1824_v19, %v1712_v12  ;;  %v1826_v61 = vadd.f32 1.0, %v2852_v16 }
 0x9d8   :  { %v1838_v53 = vmul.f32 %v1822_v22, %v1710_v33 }
 0x9d9   :  { %v1848_v24 = vpack.c.bf16 %v1840_v28, %v1836_v26  ;;  %v1842_v36 = vmul.f32 %v1826_v61, %v1714_v25  ;;  %v2854_v38 = vpop.eup %2853 }
 0x9da   :  { %v2856_v40 = vpop.eup %2855  ;;  %v1821_v42 = vadd.f32 1.0, %v2854_v38 }
 0x9db   :  { %2125 = vmatmul.bf16.gmra.mxu0 %v1848_v24  ;;  %v1850_v41 = vpack.c.bf16 %v1842_v36, %v1838_v53  ;;  %v1825_v10 = vadd.f32 1.0, %v2856_v40  ;;  %v2858_v35 = vpop.eup %2857 }
 0x9dc   :  { %v1837_v44 = vmul.f32 %v1821_v42, %v1709_v46  ;;  %v2860_v45 = vpop.eup %2859  ;;  %v1823_v43 = vadd.f32 1.0, %v2858_v35 }
 0x9dd   :  { %2163 = vmatmul.bf16.gmra.mxu1 %v1850_v41  ;;  %v1841_v11 = vmul.f32 %v1825_v10, %v1713_v37  ;;  %v1827_v51 = vadd.f32 1.0, %v2860_v45 }
 0x9de   :  { %v1839_v52 = vmul.f32 %v1823_v43, %v1711_v49 }
 0x9df   :  { %v1849_v18 = vpack.c.bf16 %v1841_v11, %v1837_v44  ;;  %v1843_v54 = vmul.f32 %v1827_v51, %v1715_v50 }
 0x9e1   :  { %2144 = vmatmul.bf16.gmra.mxu3 %v1849_v18  ;;  %v1851_v60 = vpack.c.bf16 %v1843_v54, %v1839_v52 }
 0x9e3   :  { %2182 = vmatmul.bf16.gmra.mxu2 %v1851_v60 }
 0xa48   :  { %v2121_v6 = vpop.f32.mrf.mxu0 }
 0xa49   :  { %v2159_v47 = vpop.f32.mrf.mxu1  ;;  %v2122_v14 = vadd.f32 %v2746_v27, %v2121_v6 }
 0xa50   :  { %v2123_v59 = vpop.f32.mrf.mxu0 }
 0xa51   :  { %v2124_v34 = vadd.f32 %v2746_v27, %v2123_v59  ;;  %v2161_v8 = vpop.f32.mrf.mxu1 }
 0xa54   :  { %v2140_v23 = vpop.f32.mrf.mxu3 }
 0xa55   :  { %v2141_v57 = vadd.f32 %v2140_v23, %v2122_v14  ;;  %v2178_v0 = vpop.f32.mrf.mxu2 }
 0xa57   :  { %v2160_v15 = vadd.f32 %v2159_v47, %v2141_v57 }
 0xa58   :  { %v2126_v63 = vpop.f32.mrf.mxu0 }
 0xa59   :  { %v2179_v5 = vadd.f32 %v2178_v0, %v2160_v15  ;;  %v2127_v7 = vadd.f32 %v2746_v27, %v2126_v63 }
 0xa5a   :  { %v2164_v32 = vpop.f32.mrf.mxu1 }
 0xa5b   :  { %v2188_v62 = vadd.f32 %v2179_v5, %v3387_v48 }
 0xa5c   :  { %v2142_v2 = vpop.f32.mrf.mxu3 }
 0xa5d   :  { %2192 = vst [vmem:[#allocation14] sm:$0xff] %v2188_v62  ;;  %v2143_v20 = vadd.f32 %v2142_v2, %v2124_v34  ;;  %v2180_v31 = vpop.f32.mrf.mxu2 }
 0xa5f   :  { %v2162_v3 = vadd.f32 %v2161_v8, %v2143_v20 }
 0xa60   :  { %v2128_v17 = vpop.f32.mrf.mxu0 }
 0xa61   :  { %v2181_v39 = vadd.f32 %v2180_v31, %v2162_v3  ;;  %v2129_v48 = vadd.f32 %v2746_v27, %v2128_v17 }
 0xa62   :  { %v2166_v26 = vpop.f32.mrf.mxu1 }
 0xa63   :  { %v2189_v56 = vadd.f32 %v2181_v39, %v3392_v55 }
 0xa64   :  { %v2145_v9 = vpop.f32.mrf.mxu3 }
 0xa65   :  { %2193 = vst [vmem:[#allocation14 + $0x8] sm:$0xff] %v2189_v56  ;;  %v2146_v12 = vadd.f32 %v2145_v9, %v2127_v7 }
 0xa66   :  { %v2183_v19 = vpop.f32.mrf.mxu2 }
 0xa67   :  { %v2165_v13 = vadd.f32 %v2164_v32, %v2146_v12 }
 0xa69   :  { %v2184_v1 = vadd.f32 %v2183_v19, %v2165_v13 }
 0xa6b   :  { %v2190_v21 = vadd.f32 %v2184_v1, %v3397_v58 }
 0xa6c   :  { %v2147_v22 = vpop.f32.mrf.mxu3 }
 0xa6d   :  { %2194 = vst [vmem:[#allocation14 + $0x10] sm:$0xff] %v2190_v21  ;;  %v2148_v16 = vadd.f32 %v2147_v22, %v2129_v48 }
 0xa6e   :  { %v2185_v29 = vpop.f32.mrf.mxu2 }
 0xa6f   :  { %v2167_v28 = vadd.f32 %v2166_v26, %v2148_v16 }
 0xa71   :  { %v2186_v55 = vadd.f32 %v2185_v29, %v2167_v28 }
 0xa73   :  { %v2191_v30 = vadd.f32 %v2186_v55, %v3402_v4 }
 0xa75   :  { %2195 = vst [vmem:[#allocation14 + $0x18] sm:$0xff] %v2191_v30 }
 0xa76   :  { %2208 = dma.vmem_to_hbm [thread:$0]  %s2201_s28, 512, %s2203_s30, [#allocation4], %s3074_s25, %s3074_s25, %s3075_s26  }
 0xa77   :  { %3064 = dma.done.wait [#allocation4], 512  }
 0xa78   :  { %3065 = vsyncadd [#allocation4], 4294966784 }
 0xa79   :  { %2213 = vsyncpa [#allocation3], 1 }
 0xa7a   :  { %2214 = vsyncpa [#allocation6], 1 }
 0xa7b   :  { %2215 = vsyncpa [#allocation9], 1 }
 0xa7c   :  { %2216 = vsyncpa [#allocation12], 1 }
 0xa7d   :  { %2217 = vsyncpa [#allocation4], 1 }

</bundles_post_ra>
